<compile_context>
chip_gen: v6e
topology: v6e:2x2x1
jax: 0.10.0
libtpu: 0.0.40
codegen_flags: <defaults>
</compile_context>

<pallas_src>
import functools
import math

import jax
import jax.numpy as jnp
from jax.experimental import pallas as pl
from jax.experimental.pallas import tpu as pltpu


def _self_attn_kernel(*refs, num_heads, has_mask, exp_bf16):
    if has_mask:
        (x_ref, mask_ref, w_in_ref, b_in_ref, wo_ref, bo_ref,
         w1_ref, b1_ref, w2_ref, b2_ref, out_ref, ctx_ref) = refs
    else:
        (x_ref, w_in_ref, b_in_ref, wo_ref, bo_ref,
         w1_ref, b1_ref, w2_ref, b2_ref, out_ref, ctx_ref) = refs
        mask_ref = None

    x = x_ref[...]                               # (L, TN, E) f32 -- native (L, N, E) layout
    L, TN, E = x.shape
    H = num_heads
    d = E // H

    x2d = x.reshape(L * TN, E)                   # l-major rows for all row-wise matmuls
    xb = x2d.astype(jnp.bfloat16)

    # Fused QKV projection on the MXU; Q columns already pre-scaled by 1/sqrt(d).
    qkv = jnp.dot(xb, w_in_ref[...], preferred_element_type=jnp.float32) + b_in_ref[...]

    # One in-VMEM relayout (XLU) to batch-major for the attention contractions.
    qkv_b = jnp.swapaxes(qkv.reshape(L, TN, 3 * E), 0, 1)        # (TN, L, 3E) f32

    if has_mask:
        # Build the -1e30 additive bias in-kernel from the int8 mask; hoist its
        # (TN, L, L) broadcast out of the per-head loop (JAX does not CSE broadcasts).
        bias2d = mask_ref[...].astype(jnp.float32) * jnp.float32(-1e30)   # (TN, L)
        bias = jnp.broadcast_to(bias2d[:, None, :], (TN, L, L))

    for h in range(H):                           # static loop over heads (H is small)
        qh = qkv_b[:, :, h * d:(h + 1) * d].astype(jnp.bfloat16)
        kh = qkv_b[:, :, E + h * d:E + (h + 1) * d].astype(jnp.bfloat16)
        vh = qkv_b[:, :, 2 * E + h * d:2 * E + (h + 1) * d].astype(jnp.bfloat16)

        s = jnp.einsum('bqd,bkd->bqk', qh, kh,
                       preferred_element_type=jnp.float32)        # (TN, L, L) f32
        if has_mask:
            s = s + bias
        s = s - jnp.max(s, axis=-1, keepdims=True)
        if exp_bf16:
            p = jnp.exp(s.astype(jnp.bfloat16))                   # bf16 EUP path (v6e/v7x)
            row_sum = jnp.sum(p, axis=-1, keepdims=True, dtype=jnp.float32)
        else:
            p32 = jnp.exp(s)                                      # f32 EUP (v5e / unknown)
            row_sum = jnp.sum(p32, axis=-1, keepdims=True)
            p = p32.astype(jnp.bfloat16)

        o = jnp.einsum('bqk,bkd->bqd', p, vh,
                       preferred_element_type=jnp.float32)        # (TN, L, d) f32
        # Normalize AFTER the PV matmul: L*d multiplies instead of L*L.
        o = o * pl.reciprocal(row_sum, approx=True)
        ctx_ref[:, :, h * d:(h + 1) * d] = o                      # scratch bounds live ranges

    # Back to l-major rows for out-projection + residual (one in-VMEM relayout).
    attn = jnp.swapaxes(ctx_ref[...], 0, 1).reshape(L * TN, E)

    y = jnp.dot(attn.astype(jnp.bfloat16), wo_ref[...],
                preferred_element_type=jnp.float32) + bo_ref[...]
    x1 = x2d + y                                                  # residual in f32

    h1 = jnp.maximum(
        jnp.dot(x1.astype(jnp.bfloat16), w1_ref[...],
                preferred_element_type=jnp.float32) + b1_ref[...], 0.0)
    y2 = jnp.dot(h1.astype(jnp.bfloat16), w2_ref[...],
                 preferred_element_type=jnp.float32) + b2_ref[...]

    out_ref[...] = (x1 + y2).reshape(L, TN, E).astype(out_ref.dtype)


def _tpu_info():
    """Best-effort hardware query; safe defaults when unavailable."""
    vmem_phys = 128 * 2**20
    try:
        vmem_phys = int(pltpu.get_tpu_info().vmem_capacity_bytes)
    except Exception:
        pass
    kind = ""
    try:
        kind = jax.devices()[0].device_kind.lower()
    except Exception:
        pass
    return vmem_phys, kind


def self_attention_layer(x_lne, params, key_padding_mask=None, *, num_heads, batch_tile=None):
    """x_lne: (L, N, E) float32 — same convention as the PyTorch module (eval mode)."""
    L, N, E = x_lne.shape
    assert E % num_heads == 0
    d = E // num_heads
    FC = params["w1_t"].shape[1]
    H = num_heads

    vmem_phys, kind = _tpu_info()
    is_v7 = "v7" in kind
    exp_bf16 = ("v6" in kind) or is_v7           # bf16 EUP exp only on v6e/v7x

    # Fold 1/sqrt(d) into the Q columns of the in_proj weight and bias; cast weights to bf16.
    scale = 1.0 / math.sqrt(d)
    w_in = params["w_in_t"].astype(jnp.float32).at[:, :E].multiply(scale)
    b_in = params["b_in"].astype(jnp.float32).at[:, :E].multiply(scale)
    w_in_b = w_in.astype(jnp.bfloat16)
    wo_b = params["wo_t"].astype(jnp.bfloat16)
    w1_b = params["w1_t"].astype(jnp.bfloat16)
    w2_b = params["w2_t"].astype(jnp.bfloat16)
    bo = params["bo"].astype(jnp.float32)
    b1 = params["b1"].astype(jnp.float32)
    b2 = params["b2"].astype(jnp.float32)

    has_mask = key_padding_mask is not None

    # Single-buffered bf16 weights + f32 biases (grid-invariant).
    weight_bytes = 2 * (E * 3 * E + E * E + E * FC + FC * E) + 4 * (3 * E + E + FC + E)

    def act_bytes(t):
        rows = t * L
        b = 2 * 2 * rows * E * 4                              # x / out blocks, double-buffered
        if has_mask:
            b += 2 * t * L                                    # int8 mask, double-buffered
        b += 2 * rows * 3 * E * 4                             # qkv slab + batch-major copy
        b += rows * E * 4                                     # ctx scratch
        b += t * L * L * (4 + 2) + (t * L * L * 4 if has_mask else 0)  # scores, p, bias bcast
        b += rows * FC * 6                                    # FFN hidden f32 + bf16 copy
        b += 3 * rows * E * 4                                 # x1 / y / y2 temps
        return b

    # Generation-aware VMEM budget: ~56 MiB on v7x (64 MiB/TC), ~100 MiB on 128 MiB parts.
    if is_v7 or vmem_phys <= 64 * 2**20:
        budget = 56 * 2**20
    else:
        budget = 100 * 2**20
    vmem_limit = int(min(budget, vmem_phys))

    # Batch tile: target ~512 MXU rows (tn*L) per grid step, shrink to fit the budget.
    if batch_tile is not None:
        tn = int(batch_tile)
    else:
        tn = max(1, 512 // max(L, 1))
    tn = max(1, min(tn, N))
    if is_v7 and N >= 16:
        tn = min(tn, -(-N // 2))                  # >=2 grid steps so both v7x TCs have work
    while tn > 1 and weight_bytes + act_bytes(tn) > budget:
        tn = max(1, tn // 2)
    if tn < N and tn % 8 != 0:                    # sublane (8) alignment when multi-tile
        tn = ((tn + 7) // 8) * 8

    n_tiles = pl.cdiv(N, tn)
    n_pad = n_tiles * tn

    x = x_lne.astype(jnp.float32)                 # native (L, N, E); no host-side relayout
    if n_pad != N:
        x = jnp.pad(x, ((0, 0), (0, n_pad - N), (0, 0)))

    if has_mask:
        mask_i8 = key_padding_mask.astype(jnp.int8)           # (N, L)
        if n_pad != N:
            mask_i8 = jnp.pad(mask_i8, ((0, n_pad - N), (0, 0)))

    rows_total = n_pad * L
    flops = 2 * rows_total * (3 * E * E + E * E + 2 * E * FC) + 4 * n_pad * H * L * L * d
    transcendentals = n_pad * H * L * L
    bytes_accessed = 2 * rows_total * E * 4 + (n_pad * L if has_mask else 0) + weight_bytes
    cost = pl.CostEstimate(flops=int(flops), transcendentals=int(transcendentals),
                           bytes_accessed=int(bytes_accessed))

    def build(single_buffer_weights):
        def full(shape):
            nd = len(shape)
            if single_buffer_weights:
                return pl.BlockSpec(shape, lambda i: (0,) * nd,
                                    pipeline_mode=pl.Buffered(1))
            return pl.BlockSpec(shape, lambda i: (0,) * nd)

        in_specs = [pl.BlockSpec((L, tn, E), lambda i: (0, i, 0))]        # x (native layout)
        if has_mask:
            in_specs.append(pl.BlockSpec((tn, L), lambda i: (i, 0)))      # int8 mask
        in_specs += [full((E, 3 * E)), full((1, 3 * E)),                  # in_proj (transposed)
                     full((E, E)), full((1, E)),                          # out_proj
                     full((E, FC)), full((1, FC)),                        # fc1
                     full((FC, E)), full((1, E))]                         # fc2

        return pl.pallas_call(
            functools.partial(_self_attn_kernel, num_heads=H, has_mask=has_mask,
                              exp_bf16=exp_bf16),
            out_shape=jax.ShapeDtypeStruct((L, n_pad, E), jnp.float32),
            grid=(n_tiles,),
            in_specs=in_specs,
            out_specs=pl.BlockSpec((L, tn, E), lambda i: (0, i, 0)),
            scratch_shapes=[pltpu.VMEM((tn, L, E), jnp.float32)],
            compiler_params=pltpu.CompilerParams(
                dimension_semantics=("parallel",),
                vmem_limit_bytes=vmem_limit),
            cost_estimate=cost,
        )

    call_args = [x] + ([mask_i8] if has_mask else []) + \
                [w_in_b, b_in, wo_b, bo, w1_b, b1, w2_b, b2]

    try:
        out = build(True)(*call_args)
    except Exception:
        # Fallback if single-buffered (pl.Buffered(1)) grid-invariant weights are not
        # supported by this jax version; default double-buffering is still correct.
        out = build(False)(*call_args)

    if n_pad != N:
        out = out[:, :N, :]
    return out                                   # already (L, N, E); no transpose needed


def reference(x_lne, params, key_padding_mask, num_heads):
    """Pure-JAX mirror of nn.MultiheadAttention (eval) + FFN, for verification."""
    L, N, E = x_lne.shape
    d = E // num_heads
    x = x_lne
    qkv = jnp.einsum('lne,ef->lnf', x, params["w_in_t"]) + params["b_in"][0]
    q, k, v = qkv[..., :E], qkv[..., E:2 * E], qkv[..., 2 * E:]
    split = lambda t: t.reshape(L, N, num_heads, d)
    q, k, v = split(q) / math.sqrt(d), split(k), split(v)
    s = jnp.einsum('lnhd,mnhd->nhlm', q, k)
    if key_padding_mask is not None:
        s = s + jnp.where(key_padding_mask, -1e30, 0.0)[:, None, None, :]
    p = jax.nn.softmax(s, axis=-1)
    o = jnp.einsum('nhlm,mnhd->lnhd', p, v).reshape(L, N, E)
    y = o @ params["wo_t"] + params["bo"][0]
    x1 = x + y
    h1 = jax.nn.relu(x1 @ params["w1_t"] + params["b1"][0])
    y2 = h1 @ params["w2_t"] + params["b2"][0]
    return x1 + y2


def init_params(key, embed_dim, fc_dim):
    ks = jax.random.split(key, 8)
    s = 0.1
    return {
        # stored pre-transposed so kernel does x @ W (PyTorch Linear is x @ W^T)
        "w_in_t": s * jax.random.normal(ks[0], (embed_dim, 3 * embed_dim), jnp.float32),
        "b_in":   s * jax.random.normal(ks[1], (1, 3 * embed_dim), jnp.float32),
        "wo_t":   s * jax.random.normal(ks[2], (embed_dim, embed_dim), jnp.float32),
        "bo":     s * jax.random.normal(ks[3], (1, embed_dim), jnp.float32),
        "w1_t":   s * jax.random.normal(ks[4], (embed_dim, fc_dim), jnp.float32),
        "b1":     s * jax.random.normal(ks[5], (1, fc_dim), jnp.float32),
        "w2_t":   s * jax.random.normal(ks[6], (fc_dim, embed_dim), jnp.float32),
        "b2":     s * jax.random.normal(ks[7], (1, embed_dim), jnp.float32),
    }


if __name__ == "__main__":
    L, N, E, H, FC = 8, 2, 32, 4, 64
    key = jax.random.PRNGKey(0)
    kx, kp = jax.random.split(key)
    x = jax.random.normal(kx, (L, N, E), jnp.float32)
    params = init_params(kp, E, FC)
    # key_padding_mask: (N, L); True = ignore this position.
    key_padding_mask = jnp.array(
        [[False] * L,
         [False] * (L - 2) + [True] * 2], dtype=bool)

    # Masked path.
    out = jax.block_until_ready(
        self_attention_layer(x, params, key_padding_mask, num_heads=H))
    ref = reference(x, params, key_padding_mask, H)
    assert out.shape == (L, N, E)
    err = float(jnp.max(jnp.abs(out - ref)))
    assert jnp.allclose(out, ref, atol=5e-2, rtol=5e-2), err   # bf16 matmuls -> looser tol

    # Unmasked path (exercises the mask-free kernel variant).
    out2 = jax.block_until_ready(self_attention_layer(x, params, None, num_heads=H))
    ref2 = reference(x, params, None, H)
    err2 = float(jnp.max(jnp.abs(out2 - ref2)))
    assert jnp.allclose(out2, ref2, atol=5e-2, rtol=5e-2), err2

    print("KERNEL_OK")
</pallas_src>

<mosaic_0001>
module attributes {stable_mosaic.version = 11 : i64} {
  func.func @_self_attn_kernel(%arg0: i32, %arg1: memref<8x2x32xf32, #tpu.memory_space<vmem>>, %arg2: memref<2x8xi8, #tpu.memory_space<vmem>>, %arg3: memref<32x96xbf16, #tpu.memory_space<vmem>>, %arg4: memref<1x96xf32, #tpu.memory_space<vmem>>, %arg5: memref<32x32xbf16, #tpu.memory_space<vmem>>, %arg6: memref<1x32xf32, #tpu.memory_space<vmem>>, %arg7: memref<32x64xbf16, #tpu.memory_space<vmem>>, %arg8: memref<1x64xf32, #tpu.memory_space<vmem>>, %arg9: memref<64x32xbf16, #tpu.memory_space<vmem>>, %arg10: memref<1x32xf32, #tpu.memory_space<vmem>>, %arg11: memref<8x2x32xf32, #tpu.memory_space<vmem>>, %arg12: memref<2x8x32xf32, #tpu.memory_space<vmem>>) attributes {dimension_semantics = [#tpu.dimension_semantics<parallel>], iteration_bounds = array<i64: 1>, scalar_prefetch = 0 : i64, scratch_operands = 1 : i64, tpu.core_type = #tpu.core_type<tc>, window_params = [{transform_indices = @transform_0, window_bounds = array<i64: 8, 2, 32>}, {transform_indices = @transform_1, window_bounds = array<i64: 2, 8>}, {pipeline_mode = #tpu.pipeline_mode<synchronous>, transform_indices = @transform_2, window_bounds = array<i64: 32, 96>}, {pipeline_mode = #tpu.pipeline_mode<synchronous>, transform_indices = @transform_3, window_bounds = array<i64: 1, 96>}, {pipeline_mode = #tpu.pipeline_mode<synchronous>, transform_indices = @transform_4, window_bounds = array<i64: 32, 32>}, {pipeline_mode = #tpu.pipeline_mode<synchronous>, transform_indices = @transform_5, window_bounds = array<i64: 1, 32>}, {pipeline_mode = #tpu.pipeline_mode<synchronous>, transform_indices = @transform_6, window_bounds = array<i64: 32, 64>}, {pipeline_mode = #tpu.pipeline_mode<synchronous>, transform_indices = @transform_7, window_bounds = array<i64: 1, 64>}, {pipeline_mode = #tpu.pipeline_mode<synchronous>, transform_indices = @transform_8, window_bounds = array<i64: 64, 32>}, {pipeline_mode = #tpu.pipeline_mode<synchronous>, transform_indices = @transform_9, window_bounds = array<i64: 1, 32>}, {transform_indices = @transform_10, window_bounds = array<i64: 8, 2, 32>}]} {
    %c0 = arith.constant 0 : index
    %c0_0 = arith.constant 0 : index
    %c0_1 = arith.constant 0 : index
    %0 = vector.load %arg1[%c0, %c0_0, %c0_1] : memref<8x2x32xf32, #tpu.memory_space<vmem>>, vector<8x2x32xf32>
    %1 = vector.shape_cast %0 : vector<8x2x32xf32> to vector<16x32xf32>
    %2 = arith.truncf %1 : vector<16x32xf32> to vector<16x32xbf16>
    %c0_2 = arith.constant 0 : index
    %c0_3 = arith.constant 0 : index
    %3 = vector.load %arg3[%c0_2, %c0_3] : memref<32x96xbf16, #tpu.memory_space<vmem>>, vector<32x96xbf16>
    %cst = arith.constant dense<0.000000e+00> : vector<16x96xf32>
    %4 = tpu.matmul %2, %3, %cst {dimension_numbers = #tpu.dot_dimension_numbers<[1], [0], [0], [1], [0, 0, 1, 1], [], []>} : vector<16x32xbf16>, vector<32x96xbf16>, vector<16x96xf32> -> vector<16x96xf32>
    %c0_4 = arith.constant 0 : index
    %c0_5 = arith.constant 0 : index
    %5 = vector.load %arg4[%c0_4, %c0_5] : memref<1x96xf32, #tpu.memory_space<vmem>>, vector<1x96xf32>
    %6 = vector.broadcast %5 : vector<1x96xf32> to vector<16x96xf32>
    %7 = arith.addf %4, %6 : vector<16x96xf32>
    %8 = vector.shape_cast %7 : vector<16x96xf32> to vector<8x2x96xf32>
    %9 = tpu.transpose %8, [1, 0, 2] : vector<8x2x96xf32> -> vector<2x8x96xf32>
    %c0_6 = arith.constant 0 : index
    %c0_7 = arith.constant 0 : index
    %10 = vector.load %arg2[%c0_6, %c0_7] : memref<2x8xi8, #tpu.memory_space<vmem>>, vector<2x8xi8>
    %11 = arith.sitofp %10 : vector<2x8xi8> to vector<2x8xf32>
    %cst_8 = arith.constant -1.000000e+30 : f32
    %12 = vector.broadcast %cst_8 : f32 to vector<2x8xf32>
    %13 = arith.mulf %11, %12 : vector<2x8xf32>
    %14 = vector.shape_cast %13 : vector<2x8xf32> to vector<2x1x8xf32>
    %15 = vector.shape_cast %14 : vector<2x1x8xf32> to vector<2x1x8xf32>
    %16 = vector.broadcast %15 : vector<2x1x8xf32> to vector<2x8x8xf32>
    %17 = vector.extract_strided_slice %9 {offsets = [0, 0, 0], sizes = [2, 8, 8], strides = [1, 1, 1]} : vector<2x8x96xf32> to vector<2x8x8xf32>
    %18 = arith.truncf %17 : vector<2x8x8xf32> to vector<2x8x8xbf16>
    %19 = vector.extract_strided_slice %9 {offsets = [0, 0, 32], sizes = [2, 8, 8], strides = [1, 1, 1]} : vector<2x8x96xf32> to vector<2x8x8xf32>
    %20 = arith.truncf %19 : vector<2x8x8xf32> to vector<2x8x8xbf16>
    %21 = vector.extract_strided_slice %9 {offsets = [0, 0, 64], sizes = [2, 8, 8], strides = [1, 1, 1]} : vector<2x8x96xf32> to vector<2x8x8xf32>
    %22 = arith.truncf %21 : vector<2x8x8xf32> to vector<2x8x8xbf16>
    "tpu.trace_start"() <{level = 10 : i32, message = "bqd,bkd->bqk"}> : () -> ()
    %cst_9 = arith.constant dense<0.000000e+00> : vector<2x8x8xf32>
    %23 = tpu.matmul %18, %20, %cst_9 {dimension_numbers = #tpu.dot_dimension_numbers<[2], [2], [1], [1], [0, 0, 0, 1, 1, 1], [0], [0]>} : vector<2x8x8xbf16>, vector<2x8x8xbf16>, vector<2x8x8xf32> -> vector<2x8x8xf32>
    "tpu.trace_stop"() : () -> ()
    %24 = arith.addf %23, %16 : vector<2x8x8xf32>
    %cst_10 = arith.constant dense<0xFF800000> : vector<2x8xf32>
    %25 = vector.multi_reduction <maximumf>, %24, %cst_10 [2] : vector<2x8x8xf32> to vector<2x8xf32>
    %26 = vector.shape_cast %25 : vector<2x8xf32> to vector<2x8x1xf32>
    %27 = vector.broadcast %26 : vector<2x8x1xf32> to vector<2x8x8xf32>
    %28 = arith.subf %24, %27 : vector<2x8x8xf32>
    %29 = math.exp %28 : vector<2x8x8xf32>
    %cst_11 = arith.constant dense<0.000000e+00> : vector<2x8xf32>
    %30 = vector.multi_reduction <add>, %29, %cst_11 [2] : vector<2x8x8xf32> to vector<2x8xf32>
    %31 = vector.shape_cast %30 : vector<2x8xf32> to vector<2x8x1xf32>
    %32 = arith.truncf %29 : vector<2x8x8xf32> to vector<2x8x8xbf16>
    "tpu.trace_start"() <{level = 10 : i32, message = "bqk,bkd->bqd"}> : () -> ()
    %cst_12 = arith.constant dense<0.000000e+00> : vector<2x8x8xf32>
    %33 = tpu.matmul %32, %22, %cst_12 {dimension_numbers = #tpu.dot_dimension_numbers<[2], [1], [1], [2], [0, 0, 0, 1, 1, 2], [0], [0]>} : vector<2x8x8xbf16>, vector<2x8x8xbf16>, vector<2x8x8xf32> -> vector<2x8x8xf32>
    "tpu.trace_stop"() : () -> ()
    %34 = tpu.reciprocal %31 {approx = true} : vector<2x8x1xf32> -> vector<2x8x1xf32>
    %35 = vector.broadcast %34 : vector<2x8x1xf32> to vector<2x8x8xf32>
    %36 = arith.mulf %33, %35 : vector<2x8x8xf32>
    %c0_13 = arith.constant 0 : index
    %c0_14 = arith.constant 0 : index
    %c0_15 = arith.constant 0 : index
    %37 = vector.load %arg12[%c0_13, %c0_14, %c0_15] : memref<2x8x32xf32, #tpu.memory_space<vmem>>, vector<2x8x8xf32>
    tpu.vector_store %arg12[%c0_13, %c0_14, %c0_15], %36 {strides = array<i32>} : memref<2x8x32xf32, #tpu.memory_space<vmem>>, vector<2x8x8xf32>,
    %38 = vector.extract_strided_slice %9 {offsets = [0, 0, 8], sizes = [2, 8, 8], strides = [1, 1, 1]} : vector<2x8x96xf32> to vector<2x8x8xf32>
    %39 = arith.truncf %38 : vector<2x8x8xf32> to vector<2x8x8xbf16>
    %40 = vector.extract_strided_slice %9 {offsets = [0, 0, 40], sizes = [2, 8, 8], strides = [1, 1, 1]} : vector<2x8x96xf32> to vector<2x8x8xf32>
    %41 = arith.truncf %40 : vector<2x8x8xf32> to vector<2x8x8xbf16>
    %42 = vector.extract_strided_slice %9 {offsets = [0, 0, 72], sizes = [2, 8, 8], strides = [1, 1, 1]} : vector<2x8x96xf32> to vector<2x8x8xf32>
    %43 = arith.truncf %42 : vector<2x8x8xf32> to vector<2x8x8xbf16>
    "tpu.trace_start"() <{level = 10 : i32, message = "bqd,bkd->bqk"}> : () -> ()
    %cst_16 = arith.constant dense<0.000000e+00> : vector<2x8x8xf32>
    %44 = tpu.matmul %39, %41, %cst_16 {dimension_numbers = #tpu.dot_dimension_numbers<[2], [2], [1], [1], [0, 0, 0, 1, 1, 1], [0], [0]>} : vector<2x8x8xbf16>, vector<2x8x8xbf16>, vector<2x8x8xf32> -> vector<2x8x8xf32>
    "tpu.trace_stop"() : () -> ()
    %45 = arith.addf %44, %16 : vector<2x8x8xf32>
    %cst_17 = arith.constant dense<0xFF800000> : vector<2x8xf32>
    %46 = vector.multi_reduction <maximumf>, %45, %cst_17 [2] : vector<2x8x8xf32> to vector<2x8xf32>
    %47 = vector.shape_cast %46 : vector<2x8xf32> to vector<2x8x1xf32>
    %48 = vector.broadcast %47 : vector<2x8x1xf32> to vector<2x8x8xf32>
    %49 = arith.subf %45, %48 : vector<2x8x8xf32>
    %50 = math.exp %49 : vector<2x8x8xf32>
    %cst_18 = arith.constant dense<0.000000e+00> : vector<2x8xf32>
    %51 = vector.multi_reduction <add>, %50, %cst_18 [2] : vector<2x8x8xf32> to vector<2x8xf32>
    %52 = vector.shape_cast %51 : vector<2x8xf32> to vector<2x8x1xf32>
    %53 = arith.truncf %50 : vector<2x8x8xf32> to vector<2x8x8xbf16>
    "tpu.trace_start"() <{level = 10 : i32, message = "bqk,bkd->bqd"}> : () -> ()
    %cst_19 = arith.constant dense<0.000000e+00> : vector<2x8x8xf32>
    %54 = tpu.matmul %53, %43, %cst_19 {dimension_numbers = #tpu.dot_dimension_numbers<[2], [1], [1], [2], [0, 0, 0, 1, 1, 2], [0], [0]>} : vector<2x8x8xbf16>, vector<2x8x8xbf16>, vector<2x8x8xf32> -> vector<2x8x8xf32>
    "tpu.trace_stop"() : () -> ()
    %55 = tpu.reciprocal %52 {approx = true} : vector<2x8x1xf32> -> vector<2x8x1xf32>
    %56 = vector.broadcast %55 : vector<2x8x1xf32> to vector<2x8x8xf32>
    %57 = arith.mulf %54, %56 : vector<2x8x8xf32>
    %c0_20 = arith.constant 0 : index
    %c0_21 = arith.constant 0 : index
    %c8 = arith.constant 8 : index
    %58 = vector.load %arg12[%c0_20, %c0_21, %c8] : memref<2x8x32xf32, #tpu.memory_space<vmem>>, vector<2x8x8xf32>
    tpu.vector_store %arg12[%c0_20, %c0_21, %c8], %57 {strides = array<i32>} : memref<2x8x32xf32, #tpu.memory_space<vmem>>, vector<2x8x8xf32>,
    %59 = vector.extract_strided_slice %9 {offsets = [0, 0, 16], sizes = [2, 8, 8], strides = [1, 1, 1]} : vector<2x8x96xf32> to vector<2x8x8xf32>
    %60 = arith.truncf %59 : vector<2x8x8xf32> to vector<2x8x8xbf16>
    %61 = vector.extract_strided_slice %9 {offsets = [0, 0, 48], sizes = [2, 8, 8], strides = [1, 1, 1]} : vector<2x8x96xf32> to vector<2x8x8xf32>
    %62 = arith.truncf %61 : vector<2x8x8xf32> to vector<2x8x8xbf16>
    %63 = vector.extract_strided_slice %9 {offsets = [0, 0, 80], sizes = [2, 8, 8], strides = [1, 1, 1]} : vector<2x8x96xf32> to vector<2x8x8xf32>
    %64 = arith.truncf %63 : vector<2x8x8xf32> to vector<2x8x8xbf16>
    "tpu.trace_start"() <{level = 10 : i32, message = "bqd,bkd->bqk"}> : () -> ()
    %cst_22 = arith.constant dense<0.000000e+00> : vector<2x8x8xf32>
    %65 = tpu.matmul %60, %62, %cst_22 {dimension_numbers = #tpu.dot_dimension_numbers<[2], [2], [1], [1], [0, 0, 0, 1, 1, 1], [0], [0]>} : vector<2x8x8xbf16>, vector<2x8x8xbf16>, vector<2x8x8xf32> -> vector<2x8x8xf32>
    "tpu.trace_stop"() : () -> ()
    %66 = arith.addf %65, %16 : vector<2x8x8xf32>
    %cst_23 = arith.constant dense<0xFF800000> : vector<2x8xf32>
    %67 = vector.multi_reduction <maximumf>, %66, %cst_23 [2] : vector<2x8x8xf32> to vector<2x8xf32>
    %68 = vector.shape_cast %67 : vector<2x8xf32> to vector<2x8x1xf32>
    %69 = vector.broadcast %68 : vector<2x8x1xf32> to vector<2x8x8xf32>
    %70 = arith.subf %66, %69 : vector<2x8x8xf32>
    %71 = math.exp %70 : vector<2x8x8xf32>
    %cst_24 = arith.constant dense<0.000000e+00> : vector<2x8xf32>
    %72 = vector.multi_reduction <add>, %71, %cst_24 [2] : vector<2x8x8xf32> to vector<2x8xf32>
    %73 = vector.shape_cast %72 : vector<2x8xf32> to vector<2x8x1xf32>
    %74 = arith.truncf %71 : vector<2x8x8xf32> to vector<2x8x8xbf16>
    "tpu.trace_start"() <{level = 10 : i32, message = "bqk,bkd->bqd"}> : () -> ()
    %cst_25 = arith.constant dense<0.000000e+00> : vector<2x8x8xf32>
    %75 = tpu.matmul %74, %64, %cst_25 {dimension_numbers = #tpu.dot_dimension_numbers<[2], [1], [1], [2], [0, 0, 0, 1, 1, 2], [0], [0]>} : vector<2x8x8xbf16>, vector<2x8x8xbf16>, vector<2x8x8xf32> -> vector<2x8x8xf32>
    "tpu.trace_stop"() : () -> ()
    %76 = tpu.reciprocal %73 {approx = true} : vector<2x8x1xf32> -> vector<2x8x1xf32>
    %77 = vector.broadcast %76 : vector<2x8x1xf32> to vector<2x8x8xf32>
    %78 = arith.mulf %75, %77 : vector<2x8x8xf32>
    %c0_26 = arith.constant 0 : index
    %c0_27 = arith.constant 0 : index
    %c16 = arith.constant 16 : index
    %79 = vector.load %arg12[%c0_26, %c0_27, %c16] : memref<2x8x32xf32, #tpu.memory_space<vmem>>, vector<2x8x8xf32>
    tpu.vector_store %arg12[%c0_26, %c0_27, %c16], %78 {strides = array<i32>} : memref<2x8x32xf32, #tpu.memory_space<vmem>>, vector<2x8x8xf32>,
    %80 = vector.extract_strided_slice %9 {offsets = [0, 0, 24], sizes = [2, 8, 8], strides = [1, 1, 1]} : vector<2x8x96xf32> to vector<2x8x8xf32>
    %81 = arith.truncf %80 : vector<2x8x8xf32> to vector<2x8x8xbf16>
    %82 = vector.extract_strided_slice %9 {offsets = [0, 0, 56], sizes = [2, 8, 8], strides = [1, 1, 1]} : vector<2x8x96xf32> to vector<2x8x8xf32>
    %83 = arith.truncf %82 : vector<2x8x8xf32> to vector<2x8x8xbf16>
    %84 = vector.extract_strided_slice %9 {offsets = [0, 0, 88], sizes = [2, 8, 8], strides = [1, 1, 1]} : vector<2x8x96xf32> to vector<2x8x8xf32>
    %85 = arith.truncf %84 : vector<2x8x8xf32> to vector<2x8x8xbf16>
    "tpu.trace_start"() <{level = 10 : i32, message = "bqd,bkd->bqk"}> : () -> ()
    %cst_28 = arith.constant dense<0.000000e+00> : vector<2x8x8xf32>
    %86 = tpu.matmul %81, %83, %cst_28 {dimension_numbers = #tpu.dot_dimension_numbers<[2], [2], [1], [1], [0, 0, 0, 1, 1, 1], [0], [0]>} : vector<2x8x8xbf16>, vector<2x8x8xbf16>, vector<2x8x8xf32> -> vector<2x8x8xf32>
    "tpu.trace_stop"() : () -> ()
    %87 = arith.addf %86, %16 : vector<2x8x8xf32>
    %cst_29 = arith.constant dense<0xFF800000> : vector<2x8xf32>
    %88 = vector.multi_reduction <maximumf>, %87, %cst_29 [2] : vector<2x8x8xf32> to vector<2x8xf32>
    %89 = vector.shape_cast %88 : vector<2x8xf32> to vector<2x8x1xf32>
    %90 = vector.broadcast %89 : vector<2x8x1xf32> to vector<2x8x8xf32>
    %91 = arith.subf %87, %90 : vector<2x8x8xf32>
    %92 = math.exp %91 : vector<2x8x8xf32>
    %cst_30 = arith.constant dense<0.000000e+00> : vector<2x8xf32>
    %93 = vector.multi_reduction <add>, %92, %cst_30 [2] : vector<2x8x8xf32> to vector<2x8xf32>
    %94 = vector.shape_cast %93 : vector<2x8xf32> to vector<2x8x1xf32>
    %95 = arith.truncf %92 : vector<2x8x8xf32> to vector<2x8x8xbf16>
    "tpu.trace_start"() <{level = 10 : i32, message = "bqk,bkd->bqd"}> : () -> ()
    %cst_31 = arith.constant dense<0.000000e+00> : vector<2x8x8xf32>
    %96 = tpu.matmul %95, %85, %cst_31 {dimension_numbers = #tpu.dot_dimension_numbers<[2], [1], [1], [2], [0, 0, 0, 1, 1, 2], [0], [0]>} : vector<2x8x8xbf16>, vector<2x8x8xbf16>, vector<2x8x8xf32> -> vector<2x8x8xf32>
    "tpu.trace_stop"() : () -> ()
    %97 = tpu.reciprocal %94 {approx = true} : vector<2x8x1xf32> -> vector<2x8x1xf32>
    %98 = vector.broadcast %97 : vector<2x8x1xf32> to vector<2x8x8xf32>
    %99 = arith.mulf %96, %98 : vector<2x8x8xf32>
    %c0_32 = arith.constant 0 : index
    %c0_33 = arith.constant 0 : index
    %c24 = arith.constant 24 : index
    %100 = vector.load %arg12[%c0_32, %c0_33, %c24] : memref<2x8x32xf32, #tpu.memory_space<vmem>>, vector<2x8x8xf32>
    tpu.vector_store %arg12[%c0_32, %c0_33, %c24], %99 {strides = array<i32>} : memref<2x8x32xf32, #tpu.memory_space<vmem>>, vector<2x8x8xf32>,
    %c0_34 = arith.constant 0 : index
    %c0_35 = arith.constant 0 : index
    %c0_36 = arith.constant 0 : index
    %101 = vector.load %arg12[%c0_34, %c0_35, %c0_36] : memref<2x8x32xf32, #tpu.memory_space<vmem>>, vector<2x8x32xf32>
    %102 = tpu.transpose %101, [1, 0, 2] : vector<2x8x32xf32> -> vector<8x2x32xf32>
    %103 = vector.shape_cast %102 : vector<8x2x32xf32> to vector<16x32xf32>
    %104 = arith.truncf %103 : vector<16x32xf32> to vector<16x32xbf16>
    %c0_37 = arith.constant 0 : index
    %c0_38 = arith.constant 0 : index
    %105 = vector.load %arg5[%c0_37, %c0_38] : memref<32x32xbf16, #tpu.memory_space<vmem>>, vector<32x32xbf16>
    %cst_39 = arith.constant dense<0.000000e+00> : vector<16x32xf32>
    %106 = tpu.matmul %104, %105, %cst_39 {dimension_numbers = #tpu.dot_dimension_numbers<[1], [0], [0], [1], [0, 0, 1, 1], [], []>} : vector<16x32xbf16>, vector<32x32xbf16>, vector<16x32xf32> -> vector<16x32xf32>
    %c0_40 = arith.constant 0 : index
    %c0_41 = arith.constant 0 : index
    %107 = vector.load %arg6[%c0_40, %c0_41] : memref<1x32xf32, #tpu.memory_space<vmem>>, vector<1x32xf32>
    %108 = vector.broadcast %107 : vector<1x32xf32> to vector<16x32xf32>
    %109 = arith.addf %106, %108 : vector<16x32xf32>
    %110 = arith.addf %1, %109 : vector<16x32xf32>
    %111 = arith.truncf %110 : vector<16x32xf32> to vector<16x32xbf16>
    %c0_42 = arith.constant 0 : index
    %c0_43 = arith.constant 0 : index
    %112 = vector.load %arg7[%c0_42, %c0_43] : memref<32x64xbf16, #tpu.memory_space<vmem>>, vector<32x64xbf16>
    %cst_44 = arith.constant dense<0.000000e+00> : vector<16x64xf32>
    %113 = tpu.matmul %111, %112, %cst_44 {dimension_numbers = #tpu.dot_dimension_numbers<[1], [0], [0], [1], [0, 0, 1, 1], [], []>} : vector<16x32xbf16>, vector<32x64xbf16>, vector<16x64xf32> -> vector<16x64xf32>
    %c0_45 = arith.constant 0 : index
    %c0_46 = arith.constant 0 : index
    %114 = vector.load %arg8[%c0_45, %c0_46] : memref<1x64xf32, #tpu.memory_space<vmem>>, vector<1x64xf32>
    %115 = vector.broadcast %114 : vector<1x64xf32> to vector<16x64xf32>
    %116 = arith.addf %113, %115 : vector<16x64xf32>
    %cst_47 = arith.constant 0.000000e+00 : f32
    %117 = vector.broadcast %cst_47 : f32 to vector<16x64xf32>
    %118 = arith.maximumf %116, %117 : vector<16x64xf32>
    %119 = arith.truncf %118 : vector<16x64xf32> to vector<16x64xbf16>
    %c0_48 = arith.constant 0 : index
    %c0_49 = arith.constant 0 : index
    %120 = vector.load %arg9[%c0_48, %c0_49] : memref<64x32xbf16, #tpu.memory_space<vmem>>, vector<64x32xbf16>
    %cst_50 = arith.constant dense<0.000000e+00> : vector<16x32xf32>
    %121 = tpu.matmul %119, %120, %cst_50 {dimension_numbers = #tpu.dot_dimension_numbers<[1], [0], [0], [1], [0, 0, 1, 1], [], []>} : vector<16x64xbf16>, vector<64x32xbf16>, vector<16x32xf32> -> vector<16x32xf32>
    %c0_51 = arith.constant 0 : index
    %c0_52 = arith.constant 0 : index
    %122 = vector.load %arg10[%c0_51, %c0_52] : memref<1x32xf32, #tpu.memory_space<vmem>>, vector<1x32xf32>
    %123 = vector.broadcast %122 : vector<1x32xf32> to vector<16x32xf32>
    %124 = arith.addf %121, %123 : vector<16x32xf32>
    %125 = arith.addf %110, %124 : vector<16x32xf32>
    %126 = vector.shape_cast %125 : vector<16x32xf32> to vector<8x2x32xf32>
    %c0_53 = arith.constant 0 : index
    %c0_54 = arith.constant 0 : index
    %c0_55 = arith.constant 0 : index
    %127 = vector.load %arg11[%c0_53, %c0_54, %c0_55] : memref<8x2x32xf32, #tpu.memory_space<vmem>>, vector<8x2x32xf32>
    tpu.vector_store %arg11[%c0_53, %c0_54, %c0_55], %126 {strides = array<i32>} : memref<8x2x32xf32, #tpu.memory_space<vmem>>, vector<8x2x32xf32>,
    return
  }
  func.func @transform_0(%arg0: i32) -> (i32, i32, i32) {
    %c0_i32 = arith.constant 0 : i32
    %c0_i32_0 = arith.constant 0 : i32
    %c0_i32_1 = arith.constant 0 : i32
    return %c0_i32, %arg0, %c0_i32_0 : i32, i32, i32
  }
  func.func @transform_1(%arg0: i32) -> (i32, i32) {
    %c0_i32 = arith.constant 0 : i32
    %c0_i32_0 = arith.constant 0 : i32
    return %arg0, %c0_i32 : i32, i32
  }
  func.func @transform_2(%arg0: i32) -> (i32, i32) {
    %c0_i32 = arith.constant 0 : i32
    %c0_i32_0 = arith.constant 0 : i32
    %c0_i32_1 = arith.constant 0 : i32
    return %c0_i32, %c0_i32_0 : i32, i32
  }
  func.func @transform_3(%arg0: i32) -> (i32, i32) {
    %c0_i32 = arith.constant 0 : i32
    %c0_i32_0 = arith.constant 0 : i32
    %c0_i32_1 = arith.constant 0 : i32
    return %c0_i32, %c0_i32_0 : i32, i32
  }
  func.func @transform_4(%arg0: i32) -> (i32, i32) {
    %c0_i32 = arith.constant 0 : i32
    %c0_i32_0 = arith.constant 0 : i32
    %c0_i32_1 = arith.constant 0 : i32
    return %c0_i32, %c0_i32_0 : i32, i32
  }
  func.func @transform_5(%arg0: i32) -> (i32, i32) {
    %c0_i32 = arith.constant 0 : i32
    %c0_i32_0 = arith.constant 0 : i32
    %c0_i32_1 = arith.constant 0 : i32
    return %c0_i32, %c0_i32_0 : i32, i32
  }
  func.func @transform_6(%arg0: i32) -> (i32, i32) {
    %c0_i32 = arith.constant 0 : i32
    %c0_i32_0 = arith.constant 0 : i32
    %c0_i32_1 = arith.constant 0 : i32
    return %c0_i32, %c0_i32_0 : i32, i32
  }
  func.func @transform_7(%arg0: i32) -> (i32, i32) {
    %c0_i32 = arith.constant 0 : i32
    %c0_i32_0 = arith.constant 0 : i32
    %c0_i32_1 = arith.constant 0 : i32
    return %c0_i32, %c0_i32_0 : i32, i32
  }
  func.func @transform_8(%arg0: i32) -> (i32, i32) {
    %c0_i32 = arith.constant 0 : i32
    %c0_i32_0 = arith.constant 0 : i32
    %c0_i32_1 = arith.constant 0 : i32
    return %c0_i32, %c0_i32_0 : i32, i32
  }
  func.func @transform_9(%arg0: i32) -> (i32, i32) {
    %c0_i32 = arith.constant 0 : i32
    %c0_i32_0 = arith.constant 0 : i32
    %c0_i32_1 = arith.constant 0 : i32
    return %c0_i32, %c0_i32_0 : i32, i32
  }
  func.func @transform_10(%arg0: i32) -> (i32, i32, i32) {
    %c0_i32 = arith.constant 0 : i32
    %c0_i32_0 = arith.constant 0 : i32
    %c0_i32_1 = arith.constant 0 : i32
    return %c0_i32, %arg0, %c0_i32_0 : i32, i32, i32
  }
}

module attributes {stable_mosaic.version = 11 : i64} {
  func.func @_self_attn_kernel(%arg0: i32, %arg1: memref<8x2x32xf32, #tpu.memory_space<vmem>>, %arg2: memref<2x8xi8, #tpu.memory_space<vmem>>, %arg3: memref<32x96xbf16, #tpu.memory_space<vmem>>, %arg4: memref<1x96xf32, #tpu.memory_space<vmem>>, %arg5: memref<32x32xbf16, #tpu.memory_space<vmem>>, %arg6: memref<1x32xf32, #tpu.memory_space<vmem>>, %arg7: memref<32x64xbf16, #tpu.memory_space<vmem>>, %arg8: memref<1x64xf32, #tpu.memory_space<vmem>>, %arg9: memref<64x32xbf16, #tpu.memory_space<vmem>>, %arg10: memref<1x32xf32, #tpu.memory_space<vmem>>, %arg11: memref<8x2x32xf32, #tpu.memory_space<vmem>>, %arg12: memref<2x8x32xf32, #tpu.memory_space<vmem>>) attributes {dimension_semantics = [#tpu.dimension_semantics<parallel>], iteration_bounds = array<i64: 1>, scalar_prefetch = 0 : i64, scratch_operands = 1 : i64, tpu.core_type = #tpu.core_type<tc>, window_params = [{transform_indices = @transform_0, window_bounds = array<i64: 8, 2, 32>}, {transform_indices = @transform_1, window_bounds = array<i64: 2, 8>}, {pipeline_mode = #tpu.pipeline_mode<synchronous>, transform_indices = @transform_2, window_bounds = array<i64: 32, 96>}, {pipeline_mode = #tpu.pipeline_mode<synchronous>, transform_indices = @transform_3, window_bounds = array<i64: 1, 96>}, {pipeline_mode = #tpu.pipeline_mode<synchronous>, transform_indices = @transform_4, window_bounds = array<i64: 32, 32>}, {pipeline_mode = #tpu.pipeline_mode<synchronous>, transform_indices = @transform_5, window_bounds = array<i64: 1, 32>}, {pipeline_mode = #tpu.pipeline_mode<synchronous>, transform_indices = @transform_6, window_bounds = array<i64: 32, 64>}, {pipeline_mode = #tpu.pipeline_mode<synchronous>, transform_indices = @transform_7, window_bounds = array<i64: 1, 64>}, {pipeline_mode = #tpu.pipeline_mode<synchronous>, transform_indices = @transform_8, window_bounds = array<i64: 64, 32>}, {pipeline_mode = #tpu.pipeline_mode<synchronous>, transform_indices = @transform_9, window_bounds = array<i64: 1, 32>}, {transform_indices = @transform_10, window_bounds = array<i64: 8, 2, 32>}]} {
    %c0 = arith.constant 0 : index
    %c0_0 = arith.constant 0 : index
    %c0_1 = arith.constant 0 : index
    %0 = vector.load %arg1[%c0, %c0_0, %c0_1] : memref<8x2x32xf32, #tpu.memory_space<vmem>>, vector<8x2x32xf32>
    %1 = vector.shape_cast %0 : vector<8x2x32xf32> to vector<16x32xf32>
    %2 = arith.truncf %1 : vector<16x32xf32> to vector<16x32xbf16>
    %c0_2 = arith.constant 0 : index
    %c0_3 = arith.constant 0 : index
    %3 = vector.load %arg3[%c0_2, %c0_3] : memref<32x96xbf16, #tpu.memory_space<vmem>>, vector<32x96xbf16>
    %cst = arith.constant dense<0.000000e+00> : vector<16x96xf32>
    %4 = tpu.matmul %2, %3, %cst {dimension_numbers = #tpu.dot_dimension_numbers<[1], [0], [0], [1], [0, 0, 1, 1], [], []>} : vector<16x32xbf16>, vector<32x96xbf16>, vector<16x96xf32> -> vector<16x96xf32>
    %c0_4 = arith.constant 0 : index
    %c0_5 = arith.constant 0 : index
    %5 = vector.load %arg4[%c0_4, %c0_5] : memref<1x96xf32, #tpu.memory_space<vmem>>, vector<1x96xf32>
    %6 = vector.broadcast %5 : vector<1x96xf32> to vector<16x96xf32>
    %7 = arith.addf %4, %6 : vector<16x96xf32>
    %8 = vector.shape_cast %7 : vector<16x96xf32> to vector<8x2x96xf32>
    %9 = tpu.transpose %8, [1, 0, 2] : vector<8x2x96xf32> -> vector<2x8x96xf32>
    %c0_6 = arith.constant 0 : index
    %c0_7 = arith.constant 0 : index
    %10 = vector.load %arg2[%c0_6, %c0_7] : memref<2x8xi8, #tpu.memory_space<vmem>>, vector<2x8xi8>
    %11 = arith.sitofp %10 : vector<2x8xi8> to vector<2x8xf32>
    %cst_8 = arith.constant -1.000000e+30 : f32
    %12 = vector.broadcast %cst_8 : f32 to vector<2x8xf32>
    %13 = arith.mulf %11, %12 : vector<2x8xf32>
    %14 = vector.shape_cast %13 : vector<2x8xf32> to vector<2x1x8xf32>
    %15 = vector.shape_cast %14 : vector<2x1x8xf32> to vector<2x1x8xf32>
    %16 = vector.broadcast %15 : vector<2x1x8xf32> to vector<2x8x8xf32>
    %17 = vector.extract_strided_slice %9 {offsets = [0, 0, 0], sizes = [2, 8, 8], strides = [1, 1, 1]} : vector<2x8x96xf32> to vector<2x8x8xf32>
    %18 = arith.truncf %17 : vector<2x8x8xf32> to vector<2x8x8xbf16>
    %19 = vector.extract_strided_slice %9 {offsets = [0, 0, 32], sizes = [2, 8, 8], strides = [1, 1, 1]} : vector<2x8x96xf32> to vector<2x8x8xf32>
    %20 = arith.truncf %19 : vector<2x8x8xf32> to vector<2x8x8xbf16>
    %21 = vector.extract_strided_slice %9 {offsets = [0, 0, 64], sizes = [2, 8, 8], strides = [1, 1, 1]} : vector<2x8x96xf32> to vector<2x8x8xf32>
    %22 = arith.truncf %21 : vector<2x8x8xf32> to vector<2x8x8xbf16>
    "tpu.trace_start"() <{level = 10 : i32, message = "bqd,bkd->bqk"}> : () -> ()
    %cst_9 = arith.constant dense<0.000000e+00> : vector<2x8x8xf32>
    %23 = tpu.matmul %18, %20, %cst_9 {dimension_numbers = #tpu.dot_dimension_numbers<[2], [2], [1], [1], [0, 0, 0, 1, 1, 1], [0], [0]>} : vector<2x8x8xbf16>, vector<2x8x8xbf16>, vector<2x8x8xf32> -> vector<2x8x8xf32>
    "tpu.trace_stop"() : () -> ()
    %24 = arith.addf %23, %16 : vector<2x8x8xf32>
    %cst_10 = arith.constant dense<0xFF800000> : vector<2x8xf32>
    %25 = vector.multi_reduction <maximumf>, %24, %cst_10 [2] : vector<2x8x8xf32> to vector<2x8xf32>
    %26 = vector.shape_cast %25 : vector<2x8xf32> to vector<2x8x1xf32>
    %27 = vector.broadcast %26 : vector<2x8x1xf32> to vector<2x8x8xf32>
    %28 = arith.subf %24, %27 : vector<2x8x8xf32>
    %29 = math.exp %28 : vector<2x8x8xf32>
    %cst_11 = arith.constant dense<0.000000e+00> : vector<2x8xf32>
    %30 = vector.multi_reduction <add>, %29, %cst_11 [2] : vector<2x8x8xf32> to vector<2x8xf32>
    %31 = vector.shape_cast %30 : vector<2x8xf32> to vector<2x8x1xf32>
    %32 = arith.truncf %29 : vector<2x8x8xf32> to vector<2x8x8xbf16>
    "tpu.trace_start"() <{level = 10 : i32, message = "bqk,bkd->bqd"}> : () -> ()
    %cst_12 = arith.constant dense<0.000000e+00> : vector<2x8x8xf32>
    %33 = tpu.matmul %32, %22, %cst_12 {dimension_numbers = #tpu.dot_dimension_numbers<[2], [1], [1], [2], [0, 0, 0, 1, 1, 2], [0], [0]>} : vector<2x8x8xbf16>, vector<2x8x8xbf16>, vector<2x8x8xf32> -> vector<2x8x8xf32>
    "tpu.trace_stop"() : () -> ()
    %34 = tpu.reciprocal %31 {approx = true} : vector<2x8x1xf32> -> vector<2x8x1xf32>
    %35 = vector.broadcast %34 : vector<2x8x1xf32> to vector<2x8x8xf32>
    %36 = arith.mulf %33, %35 : vector<2x8x8xf32>
    %c0_13 = arith.constant 0 : index
    %c0_14 = arith.constant 0 : index
    %c0_15 = arith.constant 0 : index
    %37 = vector.load %arg12[%c0_13, %c0_14, %c0_15] : memref<2x8x32xf32, #tpu.memory_space<vmem>>, vector<2x8x8xf32>
    tpu.vector_store %arg12[%c0_13, %c0_14, %c0_15], %36 {strides = array<i32>} : memref<2x8x32xf32, #tpu.memory_space<vmem>>, vector<2x8x8xf32>,
    %38 = vector.extract_strided_slice %9 {offsets = [0, 0, 8], sizes = [2, 8, 8], strides = [1, 1, 1]} : vector<2x8x96xf32> to vector<2x8x8xf32>
    %39 = arith.truncf %38 : vector<2x8x8xf32> to vector<2x8x8xbf16>
    %40 = vector.extract_strided_slice %9 {offsets = [0, 0, 40], sizes = [2, 8, 8], strides = [1, 1, 1]} : vector<2x8x96xf32> to vector<2x8x8xf32>
    %41 = arith.truncf %40 : vector<2x8x8xf32> to vector<2x8x8xbf16>
    %42 = vector.extract_strided_slice %9 {offsets = [0, 0, 72], sizes = [2, 8, 8], strides = [1, 1, 1]} : vector<2x8x96xf32> to vector<2x8x8xf32>
    %43 = arith.truncf %42 : vector<2x8x8xf32> to vector<2x8x8xbf16>
    "tpu.trace_start"() <{level = 10 : i32, message = "bqd,bkd->bqk"}> : () -> ()
    %cst_16 = arith.constant dense<0.000000e+00> : vector<2x8x8xf32>
    %44 = tpu.matmul %39, %41, %cst_16 {dimension_numbers = #tpu.dot_dimension_numbers<[2], [2], [1], [1], [0, 0, 0, 1, 1, 1], [0], [0]>} : vector<2x8x8xbf16>, vector<2x8x8xbf16>, vector<2x8x8xf32> -> vector<2x8x8xf32>
    "tpu.trace_stop"() : () -> ()
    %45 = arith.addf %44, %16 : vector<2x8x8xf32>
    %cst_17 = arith.constant dense<0xFF800000> : vector<2x8xf32>
    %46 = vector.multi_reduction <maximumf>, %45, %cst_17 [2] : vector<2x8x8xf32> to vector<2x8xf32>
    %47 = vector.shape_cast %46 : vector<2x8xf32> to vector<2x8x1xf32>
    %48 = vector.broadcast %47 : vector<2x8x1xf32> to vector<2x8x8xf32>
    %49 = arith.subf %45, %48 : vector<2x8x8xf32>
    %50 = math.exp %49 : vector<2x8x8xf32>
    %cst_18 = arith.constant dense<0.000000e+00> : vector<2x8xf32>
    %51 = vector.multi_reduction <add>, %50, %cst_18 [2] : vector<2x8x8xf32> to vector<2x8xf32>
    %52 = vector.shape_cast %51 : vector<2x8xf32> to vector<2x8x1xf32>
    %53 = arith.truncf %50 : vector<2x8x8xf32> to vector<2x8x8xbf16>
    "tpu.trace_start"() <{level = 10 : i32, message = "bqk,bkd->bqd"}> : () -> ()
    %cst_19 = arith.constant dense<0.000000e+00> : vector<2x8x8xf32>
    %54 = tpu.matmul %53, %43, %cst_19 {dimension_numbers = #tpu.dot_dimension_numbers<[2], [1], [1], [2], [0, 0, 0, 1, 1, 2], [0], [0]>} : vector<2x8x8xbf16>, vector<2x8x8xbf16>, vector<2x8x8xf32> -> vector<2x8x8xf32>
    "tpu.trace_stop"() : () -> ()
    %55 = tpu.reciprocal %52 {approx = true} : vector<2x8x1xf32> -> vector<2x8x1xf32>
    %56 = vector.broadcast %55 : vector<2x8x1xf32> to vector<2x8x8xf32>
    %57 = arith.mulf %54, %56 : vector<2x8x8xf32>
    %c0_20 = arith.constant 0 : index
    %c0_21 = arith.constant 0 : index
    %c8 = arith.constant 8 : index
    %58 = vector.load %arg12[%c0_20, %c0_21, %c8] : memref<2x8x32xf32, #tpu.memory_space<vmem>>, vector<2x8x8xf32>
    tpu.vector_store %arg12[%c0_20, %c0_21, %c8], %57 {strides = array<i32>} : memref<2x8x32xf32, #tpu.memory_space<vmem>>, vector<2x8x8xf32>,
    %59 = vector.extract_strided_slice %9 {offsets = [0, 0, 16], sizes = [2, 8, 8], strides = [1, 1, 1]} : vector<2x8x96xf32> to vector<2x8x8xf32>
    %60 = arith.truncf %59 : vector<2x8x8xf32> to vector<2x8x8xbf16>
    %61 = vector.extract_strided_slice %9 {offsets = [0, 0, 48], sizes = [2, 8, 8], strides = [1, 1, 1]} : vector<2x8x96xf32> to vector<2x8x8xf32>
    %62 = arith.truncf %61 : vector<2x8x8xf32> to vector<2x8x8xbf16>
    %63 = vector.extract_strided_slice %9 {offsets = [0, 0, 80], sizes = [2, 8, 8], strides = [1, 1, 1]} : vector<2x8x96xf32> to vector<2x8x8xf32>
    %64 = arith.truncf %63 : vector<2x8x8xf32> to vector<2x8x8xbf16>
    "tpu.trace_start"() <{level = 10 : i32, message = "bqd,bkd->bqk"}> : () -> ()
    %cst_22 = arith.constant dense<0.000000e+00> : vector<2x8x8xf32>
    %65 = tpu.matmul %60, %62, %cst_22 {dimension_numbers = #tpu.dot_dimension_numbers<[2], [2], [1], [1], [0, 0, 0, 1, 1, 1], [0], [0]>} : vector<2x8x8xbf16>, vector<2x8x8xbf16>, vector<2x8x8xf32> -> vector<2x8x8xf32>
    "tpu.trace_stop"() : () -> ()
    %66 = arith.addf %65, %16 : vector<2x8x8xf32>
    %cst_23 = arith.constant dense<0xFF800000> : vector<2x8xf32>
    %67 = vector.multi_reduction <maximumf>, %66, %cst_23 [2] : vector<2x8x8xf32> to vector<2x8xf32>
    %68 = vector.shape_cast %67 : vector<2x8xf32> to vector<2x8x1xf32>
    %69 = vector.broadcast %68 : vector<2x8x1xf32> to vector<2x8x8xf32>
    %70 = arith.subf %66, %69 : vector<2x8x8xf32>
    %71 = math.exp %70 : vector<2x8x8xf32>
    %cst_24 = arith.constant dense<0.000000e+00> : vector<2x8xf32>
    %72 = vector.multi_reduction <add>, %71, %cst_24 [2] : vector<2x8x8xf32> to vector<2x8xf32>
    %73 = vector.shape_cast %72 : vector<2x8xf32> to vector<2x8x1xf32>
    %74 = arith.truncf %71 : vector<2x8x8xf32> to vector<2x8x8xbf16>
    "tpu.trace_start"() <{level = 10 : i32, message = "bqk,bkd->bqd"}> : () -> ()
    %cst_25 = arith.constant dense<0.000000e+00> : vector<2x8x8xf32>
    %75 = tpu.matmul %74, %64, %cst_25 {dimension_numbers = #tpu.dot_dimension_numbers<[2], [1], [1], [2], [0, 0, 0, 1, 1, 2], [0], [0]>} : vector<2x8x8xbf16>, vector<2x8x8xbf16>, vector<2x8x8xf32> -> vector<2x8x8xf32>
    "tpu.trace_stop"() : () -> ()
    %76 = tpu.reciprocal %73 {approx = true} : vector<2x8x1xf32> -> vector<2x8x1xf32>
    %77 = vector.broadcast %76 : vector<2x8x1xf32> to vector<2x8x8xf32>
    %78 = arith.mulf %75, %77 : vector<2x8x8xf32>
    %c0_26 = arith.constant 0 : index
    %c0_27 = arith.constant 0 : index
    %c16 = arith.constant 16 : index
    %79 = vector.load %arg12[%c0_26, %c0_27, %c16] : memref<2x8x32xf32, #tpu.memory_space<vmem>>, vector<2x8x8xf32>
    tpu.vector_store %arg12[%c0_26, %c0_27, %c16], %78 {strides = array<i32>} : memref<2x8x32xf32, #tpu.memory_space<vmem>>, vector<2x8x8xf32>,
    %80 = vector.extract_strided_slice %9 {offsets = [0, 0, 24], sizes = [2, 8, 8], strides = [1, 1, 1]} : vector<2x8x96xf32> to vector<2x8x8xf32>
    %81 = arith.truncf %80 : vector<2x8x8xf32> to vector<2x8x8xbf16>
    %82 = vector.extract_strided_slice %9 {offsets = [0, 0, 56], sizes = [2, 8, 8], strides = [1, 1, 1]} : vector<2x8x96xf32> to vector<2x8x8xf32>
    %83 = arith.truncf %82 : vector<2x8x8xf32> to vector<2x8x8xbf16>
    %84 = vector.extract_strided_slice %9 {offsets = [0, 0, 88], sizes = [2, 8, 8], strides = [1, 1, 1]} : vector<2x8x96xf32> to vector<2x8x8xf32>
    %85 = arith.truncf %84 : vector<2x8x8xf32> to vector<2x8x8xbf16>
    "tpu.trace_start"() <{level = 10 : i32, message = "bqd,bkd->bqk"}> : () -> ()
    %cst_28 = arith.constant dense<0.000000e+00> : vector<2x8x8xf32>
    %86 = tpu.matmul %81, %83, %cst_28 {dimension_numbers = #tpu.dot_dimension_numbers<[2], [2], [1], [1], [0, 0, 0, 1, 1, 1], [0], [0]>} : vector<2x8x8xbf16>, vector<2x8x8xbf16>, vector<2x8x8xf32> -> vector<2x8x8xf32>
    "tpu.trace_stop"() : () -> ()
    %87 = arith.addf %86, %16 : vector<2x8x8xf32>
    %cst_29 = arith.constant dense<0xFF800000> : vector<2x8xf32>
    %88 = vector.multi_reduction <maximumf>, %87, %cst_29 [2] : vector<2x8x8xf32> to vector<2x8xf32>
    %89 = vector.shape_cast %88 : vector<2x8xf32> to vector<2x8x1xf32>
    %90 = vector.broadcast %89 : vector<2x8x1xf32> to vector<2x8x8xf32>
    %91 = arith.subf %87, %90 : vector<2x8x8xf32>
    %92 = math.exp %91 : vector<2x8x8xf32>
    %cst_30 = arith.constant dense<0.000000e+00> : vector<2x8xf32>
    %93 = vector.multi_reduction <add>, %92, %cst_30 [2] : vector<2x8x8xf32> to vector<2x8xf32>
    %94 = vector.shape_cast %93 : vector<2x8xf32> to vector<2x8x1xf32>
    %95 = arith.truncf %92 : vector<2x8x8xf32> to vector<2x8x8xbf16>
    "tpu.trace_start"() <{level = 10 : i32, message = "bqk,bkd->bqd"}> : () -> ()
    %cst_31 = arith.constant dense<0.000000e+00> : vector<2x8x8xf32>
    %96 = tpu.matmul %95, %85, %cst_31 {dimension_numbers = #tpu.dot_dimension_numbers<[2], [1], [1], [2], [0, 0, 0, 1, 1, 2], [0], [0]>} : vector<2x8x8xbf16>, vector<2x8x8xbf16>, vector<2x8x8xf32> -> vector<2x8x8xf32>
    "tpu.trace_stop"() : () -> ()
    %97 = tpu.reciprocal %94 {approx = true} : vector<2x8x1xf32> -> vector<2x8x1xf32>
    %98 = vector.broadcast %97 : vector<2x8x1xf32> to vector<2x8x8xf32>
    %99 = arith.mulf %96, %98 : vector<2x8x8xf32>
    %c0_32 = arith.constant 0 : index
    %c0_33 = arith.constant 0 : index
    %c24 = arith.constant 24 : index
    %100 = vector.load %arg12[%c0_32, %c0_33, %c24] : memref<2x8x32xf32, #tpu.memory_space<vmem>>, vector<2x8x8xf32>
    tpu.vector_store %arg12[%c0_32, %c0_33, %c24], %99 {strides = array<i32>} : memref<2x8x32xf32, #tpu.memory_space<vmem>>, vector<2x8x8xf32>,
    %c0_34 = arith.constant 0 : index
    %c0_35 = arith.constant 0 : index
    %c0_36 = arith.constant 0 : index
    %101 = vector.load %arg12[%c0_34, %c0_35, %c0_36] : memref<2x8x32xf32, #tpu.memory_space<vmem>>, vector<2x8x32xf32>
    %102 = tpu.transpose %101, [1, 0, 2] : vector<2x8x32xf32> -> vector<8x2x32xf32>
    %103 = vector.shape_cast %102 : vector<8x2x32xf32> to vector<16x32xf32>
    %104 = arith.truncf %103 : vector<16x32xf32> to vector<16x32xbf16>
    %c0_37 = arith.constant 0 : index
    %c0_38 = arith.constant 0 : index
    %105 = vector.load %arg5[%c0_37, %c0_38] : memref<32x32xbf16, #tpu.memory_space<vmem>>, vector<32x32xbf16>
    %cst_39 = arith.constant dense<0.000000e+00> : vector<16x32xf32>
    %106 = tpu.matmul %104, %105, %cst_39 {dimension_numbers = #tpu.dot_dimension_numbers<[1], [0], [0], [1], [0, 0, 1, 1], [], []>} : vector<16x32xbf16>, vector<32x32xbf16>, vector<16x32xf32> -> vector<16x32xf32>
    %c0_40 = arith.constant 0 : index
    %c0_41 = arith.constant 0 : index
    %107 = vector.load %arg6[%c0_40, %c0_41] : memref<1x32xf32, #tpu.memory_space<vmem>>, vector<1x32xf32>
    %108 = vector.broadcast %107 : vector<1x32xf32> to vector<16x32xf32>
    %109 = arith.addf %106, %108 : vector<16x32xf32>
    %110 = arith.addf %1, %109 : vector<16x32xf32>
    %111 = arith.truncf %110 : vector<16x32xf32> to vector<16x32xbf16>
    %c0_42 = arith.constant 0 : index
    %c0_43 = arith.constant 0 : index
    %112 = vector.load %arg7[%c0_42, %c0_43] : memref<32x64xbf16, #tpu.memory_space<vmem>>, vector<32x64xbf16>
    %cst_44 = arith.constant dense<0.000000e+00> : vector<16x64xf32>
    %113 = tpu.matmul %111, %112, %cst_44 {dimension_numbers = #tpu.dot_dimension_numbers<[1], [0], [0], [1], [0, 0, 1, 1], [], []>} : vector<16x32xbf16>, vector<32x64xbf16>, vector<16x64xf32> -> vector<16x64xf32>
    %c0_45 = arith.constant 0 : index
    %c0_46 = arith.constant 0 : index
    %114 = vector.load %arg8[%c0_45, %c0_46] : memref<1x64xf32, #tpu.memory_space<vmem>>, vector<1x64xf32>
    %115 = vector.broadcast %114 : vector<1x64xf32> to vector<16x64xf32>
    %116 = arith.addf %113, %115 : vector<16x64xf32>
    %cst_47 = arith.constant 0.000000e+00 : f32
    %117 = vector.broadcast %cst_47 : f32 to vector<16x64xf32>
    %118 = arith.maximumf %116, %117 : vector<16x64xf32>
    %119 = arith.truncf %118 : vector<16x64xf32> to vector<16x64xbf16>
    %c0_48 = arith.constant 0 : index
    %c0_49 = arith.constant 0 : index
    %120 = vector.load %arg9[%c0_48, %c0_49] : memref<64x32xbf16, #tpu.memory_space<vmem>>, vector<64x32xbf16>
    %cst_50 = arith.constant dense<0.000000e+00> : vector<16x32xf32>
    %121 = tpu.matmul %119, %120, %cst_50 {dimension_numbers = #tpu.dot_dimension_numbers<[1], [0], [0], [1], [0, 0, 1, 1], [], []>} : vector<16x64xbf16>, vector<64x32xbf16>, vector<16x32xf32> -> vector<16x32xf32>
    %c0_51 = arith.constant 0 : index
    %c0_52 = arith.constant 0 : index
    %122 = vector.load %arg10[%c0_51, %c0_52] : memref<1x32xf32, #tpu.memory_space<vmem>>, vector<1x32xf32>
    %123 = vector.broadcast %122 : vector<1x32xf32> to vector<16x32xf32>
    %124 = arith.addf %121, %123 : vector<16x32xf32>
    %125 = arith.addf %110, %124 : vector<16x32xf32>
    %126 = vector.shape_cast %125 : vector<16x32xf32> to vector<8x2x32xf32>
    %c0_53 = arith.constant 0 : index
    %c0_54 = arith.constant 0 : index
    %c0_55 = arith.constant 0 : index
    %127 = vector.load %arg11[%c0_53, %c0_54, %c0_55] : memref<8x2x32xf32, #tpu.memory_space<vmem>>, vector<8x2x32xf32>
    tpu.vector_store %arg11[%c0_53, %c0_54, %c0_55], %126 {strides = array<i32>} : memref<8x2x32xf32, #tpu.memory_space<vmem>>, vector<8x2x32xf32>,
    return
  }
  func.func @transform_0(%arg0: i32) -> (i32, i32, i32) {
    %c0_i32 = arith.constant 0 : i32
    %c0_i32_0 = arith.constant 0 : i32
    %c0_i32_1 = arith.constant 0 : i32
    return %c0_i32, %arg0, %c0_i32_0 : i32, i32, i32
  }
  func.func @transform_1(%arg0: i32) -> (i32, i32) {
    %c0_i32 = arith.constant 0 : i32
    %c0_i32_0 = arith.constant 0 : i32
    return %arg0, %c0_i32 : i32, i32
  }
  func.func @transform_2(%arg0: i32) -> (i32, i32) {
    %c0_i32 = arith.constant 0 : i32
    %c0_i32_0 = arith.constant 0 : i32
    %c0_i32_1 = arith.constant 0 : i32
    return %c0_i32, %c0_i32_0 : i32, i32
  }
  func.func @transform_3(%arg0: i32) -> (i32, i32) {
    %c0_i32 = arith.constant 0 : i32
    %c0_i32_0 = arith.constant 0 : i32
    %c0_i32_1 = arith.constant 0 : i32
    return %c0_i32, %c0_i32_0 : i32, i32
  }
  func.func @transform_4(%arg0: i32) -> (i32, i32) {
    %c0_i32 = arith.constant 0 : i32
    %c0_i32_0 = arith.constant 0 : i32
    %c0_i32_1 = arith.constant 0 : i32
    return %c0_i32, %c0_i32_0 : i32, i32
  }
  func.func @transform_5(%arg0: i32) -> (i32, i32) {
    %c0_i32 = arith.constant 0 : i32
    %c0_i32_0 = arith.constant 0 : i32
    %c0_i32_1 = arith.constant 0 : i32
    return %c0_i32, %c0_i32_0 : i32, i32
  }
  func.func @transform_6(%arg0: i32) -> (i32, i32) {
    %c0_i32 = arith.constant 0 : i32
    %c0_i32_0 = arith.constant 0 : i32
    %c0_i32_1 = arith.constant 0 : i32
    return %c0_i32, %c0_i32_0 : i32, i32
  }
  func.func @transform_7(%arg0: i32) -> (i32, i32) {
    %c0_i32 = arith.constant 0 : i32
    %c0_i32_0 = arith.constant 0 : i32
    %c0_i32_1 = arith.constant 0 : i32
    return %c0_i32, %c0_i32_0 : i32, i32
  }
  func.func @transform_8(%arg0: i32) -> (i32, i32) {
    %c0_i32 = arith.constant 0 : i32
    %c0_i32_0 = arith.constant 0 : i32
    %c0_i32_1 = arith.constant 0 : i32
    return %c0_i32, %c0_i32_0 : i32, i32
  }
  func.func @transform_9(%arg0: i32) -> (i32, i32) {
    %c0_i32 = arith.constant 0 : i32
    %c0_i32_0 = arith.constant 0 : i32
    %c0_i32_1 = arith.constant 0 : i32
    return %c0_i32, %c0_i32_0 : i32, i32
  }
  func.func @transform_10(%arg0: i32) -> (i32, i32, i32) {
    %c0_i32 = arith.constant 0 : i32
    %c0_i32_0 = arith.constant 0 : i32
    %c0_i32_1 = arith.constant 0 : i32
    return %c0_i32, %arg0, %c0_i32_0 : i32, i32, i32
  }
}

</mosaic_0001>

<bundles_post_ra>
// kernel: tpu_custom_call.1
= control target key start
LH: loop header
LB: loop body
LE: loop exit
PB: predicated region body
PF: predicated region fallthrough
CT: control target
= control target key end

     0   :  { %15 = vsyncpa [#allocation4], 0  ;;  %s2536_s0 = inlined_call_operand.vmem [shape: f32[8,2,32], index: 0, kind: input, shape index: {}]   ;;  %s2537_s1 = inlined_call_operand.vmem [shape: s8[2,8], index: 1, kind: input, shape index: {}]   ;;  %s2538_s2 = inlined_call_operand.vmem [shape: bf16[32,96], index: 2, kind: input, shape index: {}]   ;;  %s2539_s3 = inlined_call_operand.vmem [shape: f32[1,96], index: 3, kind: input, shape index: {}]   ;;  %s2540_s4 = inlined_call_operand.vmem [shape: bf16[32,32], index: 4, kind: input, shape index: {}]   ;;  %s2541_s5 = inlined_call_operand.vmem [shape: f32[1,32], index: 5, kind: input, shape index: {}]   ;;  %s2542_s6 = inlined_call_operand.hbm [shape: bf16[32,64], index: 6, kind: input, shape index: {}]   ;;  %s2543_s7 = inlined_call_operand.vmem [shape: f32[1,64], index: 7, kind: input, shape index: {}]   ;;  %s2544_s8 = inlined_call_operand.vmem [shape: bf16[64,32], index: 8, kind: input, shape index: {}]   ;;  %s2545_s9 = inlined_call_operand.vmem [shape: f32[1,32], index: 9, kind: input, shape index: {}]   ;;  %s2546_s10 = inlined_call_operand.hbm [shape: f32[8,2,32], index: 10, kind: output, shape index: {}]  }
   0x1   :  { %16 = vsyncpa [#allocation5], 0  ;;  %s2083_s13 = smov [#allocation3]  }
   0x2   :  { %s34_s14 = sshll.u32 %s2083_s13, 4  ;;  %s35_s14 = int_to_ptr.vmem [resolvable:$true] %s34_s14 }
   0x3   :  { %s2047_s15 = scalar_lea.vmem %s35_s14, 256  ;;  %p2052_p1 = scmp.lt.s32.totalorder %s35_s14, %s35_s14 }
   0x4   :  { %p2048_p0 = scmp.ne.s32.totalorder %s35_s14, %s2047_s15  ;;  %p2053_p2 = scmp.lt.s32.totalorder %s2047_s15, %s2047_s15 }
   0x6   :  { %p2054_p3 = por %p2053_p2, %p2052_p1 }
   0x8   :  { %p2055_p4 = pnand %p2054_p3, %p2048_p0 }
   0xa   :  { %2058 = shalt.err (!%p2055_p4)
}
   0xb   :  { %s2084_s16 = smov 64   ;;  %s2085_s17 = smov 4  }
   0xc   :  { %40 = dma.hbm_to_vmem [thread:$0]  %s2542_s6, 256, %s35_s14, [#allocation4], %s2084_s16, %s2084_s16, %s2085_s17  }
   0xd   :  { %2079 = dma.done.wait [#allocation4], 256  }
   0xe   :  { %2080 = vsyncadd [#allocation4], 4294967040  ;;  %v72_v0 = vlaneseq  ;;  %v2086_v1 = vmov 0.0   ;;  %vm2087_vm0 = vmmov 0   ;;  %v2088_v2 = vmov 1983009808  }
   0xf   :  { %1841 = vmatprep.subr.bf16.mxu0 %v2086_v1  ;;  %1845 = vmatprep.mubr.msk.bf16.mxu0 %vm2087_vm0, %v2086_v1  ;;  %v70_v3 = vunpack.c.l.s4 %v2088_v2  ;;  %v1997_v6 = vld [vmem:[%s2538_s2 + $0x8] sm:$0xff]   ;;  %v1998_v7 = vld [vmem:[%s2538_s2] sm:$0xff]   ;;  %vm127_vm1 = vcmask 261120   ;;  %v2089_v30 = vmov 1934713408   ;;  %s2091_s6 = smov 88  }
  0x10   :  { %1849 = vmatprep.subr.bf16.mxu1 %v2086_v1  ;;  %1851 = vmatprep.mubr.msk.bf16.mxu1 %vm2087_vm0, %v2086_v1  ;;  %v2173_v5 = vshrl.u32 %v72_v0, 7  ;;  %v2187_v9 = vld [vmem:[%s2536_s0] sm:$0x3]  ;;  %v2192_v10 = vld [vmem:[%s2536_s0 + $0x2] sm:$0x3]  ;;  %v218_v31 = vunpack.c.l.s4 %v2089_v30  ;;  %s2092_s20 = smov 120  }
  0x11   :  { %v71_v4 = vunpack.c.0.s8 %v70_v3  ;;  %1842 = vmatpush3.bf16.msra.mxu0 %v1997_v6  ;;  %v2197_v11 = vld [vmem:[%s2536_s0 + $0x4] sm:$0x3]  ;;  %v2203_v12 = vld [vmem:[%s2536_s0 + $0x6] sm:$0x3]  ;;  %v2208_v13 = vld [vmem:[%s2536_s0 + $0x8] sm:$0x3]  ;;  %v67_v15 = vcombine.low %v2187_v9, %v2192_v10 }
  0x12   :  { %1843 = vmatprep.subr.bf16.mxu0 %v2086_v1  ;;  %v2213_v14 = vld [vmem:[%s2536_s0 + $0xa] sm:$0x3]  ;;  %v2220_v16 = vld [vmem:[%s2536_s0 + $0xc] sm:$0x3]  ;;  %v2225_v17 = vld [vmem:[%s2536_s0 + $0xe] sm:$0x3]  ;;  %v68_v18 = vcombine.low %v2197_v11, %v2203_v12  ;;  %v219_v36 = vunpack.c.0.s8 %v218_v31 }
  0x13   :  { %v2182_v8 = vsub.s32 %v71_v4, %v2173_v5  ;;  %v84_v19 = vcombine.low %v2208_v13, %v2213_v14  ;;  %v85_v21 = vcombine.low %v2220_v16, %v2225_v17  ;;  %v1759_v28 = vld [vmem:[%s2539_s3] ss:$0 sm:$0xff]  ;;  %s2090_s3 = smov 96   ;;  %vm338_vm2 = vcmask 64512   ;;  %s2096_s23 = smov 112  }
  0x14   :  { %v2248_v45 = vsub.s32 %v219_v36, %v2173_v5  ;;  %vm459_vm3 = vcmask 1043456   ;;  %s2097_s24 = smov 48   ;;  %s2098_s25 = smov 72   ;;  %vm785_vm4 = vcmask 130112   ;;  %vm1016_vm5 = vcmask 195712  }
  0x15   :  { %v75_v20 = vrot.slane %v67_v15, %v2182_v8  ;;  %1844 = vmatpush3.bf16.msra.mxu0 %v1998_v7  ;;  %v82_v22 = vrot.slane %v68_v18, %v2182_v8  ;;  %v92_v23 = vrot.slane %v84_v19, %v2182_v8  ;;  %v99_v24 = vrot.slane %v85_v21, %v2182_v8  ;;  %s2099_s26 = smov 104   ;;  %s2100_s27 = smov 40  }
  0x16   :  { %1855 = vmatprep.subr.bf16.mxu0 %v2086_v1  ;;  %s2101_s28 = smov 8   ;;  %s2102_s2 = smov 16   ;;  %vm1247_vm6 = vcmask 261312   ;;  %vm1636_vm7 = vcmask 523264   ;;  %vm1733_vm8 = vcmask 254976  }
  0x17   :  { %v83_v25 = vcombine.low %v75_v20, %v82_v22  ;;  %v100_v26 = vcombine.low %v92_v23, %v99_v24  ;;  %v252_v22 = vld [vmem:[%s2537_s1] sm:$0x1]  ;;  %v2093_v24 = vmov 1966171168   ;;  %s2094_s1 = smov 56   ;;  %s2103_s13 = smov 24  }
  0x18   :  { %v253_v23 = vunpack.c.0.s8 %v252_v22 }
  0x19   :  { %v103_v27 = vpack.c.bf16 %v100_v26, %v83_v25  ;;  %v258_v25 = vunpack.c.l.s4 %v2093_v24 }
  0x1a   :  { %v254_v26 = vcvt.s32.f32 %v253_v23 }
  0x1b   :  { %1846 = vmatmul.mubr.msk.bf16.vlgmr.msra.gmra.mxu0 %vm127_vm1, %v103_v27  ;;  %v259_v27 = vunpack.c.0.s8 %v258_v25 }
  0x1c   :  { %1857 = vmatprep.mubr.msk.bf16.mxu0 %vm2087_vm0, %v2086_v1 }
  0xdb   :  { %v165_v29 = vpop.f32.mrf.mxu0 }
  0xdc   :  { %v166_v32 = vadd.f32 %v1759_v28, %v165_v29  ;;  %v262_v29 = vsub.s32 %v259_v27, %v2173_v5 }
  0xdd   :  { %v1847_v33 = vpop.f32.mrf.mxu0 }
  0xde   :  { %v174_v34 = vcombine.high %v166_v32, %v166_v32  ;;  %v181_v35 = vrot.slane %v166_v32, %v2182_v8  ;;  %v281_v32 = vsub.s32 0, %v2173_v5 }
  0xdf   :  { %v168_v37 = vpop.f32.mrf.mxu0 }
  0xe0   :  { %v188_v38 = vrot.slane %v174_v34, %v2182_v8  ;;  %v189_v39 = vcombine.high %v181_v35, %v181_v35  ;;  %v169_v40 = vadd.f32 %v1759_v28, %v168_v37  ;;  %v255_v28 = vmul.f32 -1e+30, %v254_v26 }
  0xe1   :  { %v1848_v41 = vpop.f32.mrf.mxu0 }
  0xe2   :  { %v190_v42 = vcombine.high %v188_v38, %v188_v38  ;;  %v191_v43 = vcombine.high %v169_v40, %v169_v40  ;;  %v198_v44 = vrot.slane %v169_v40, %v2182_v8  ;;  %v216_v46 = vcombine.low %v181_v35, %v189_v39 }
  0xe3   :  { %v263_v30 = vrot.slane %v255_v28, %v262_v29 }
  0xe4   :  { %v225_v47 = vcombine.low %v188_v38, %v190_v42  ;;  %v205_v48 = vrot.slane %v191_v43, %v2182_v8  ;;  %v206_v49 = vcombine.high %v198_v44, %v198_v44  ;;  %v223_v53 = vrot.slane %v216_v46, %v2248_v45 }
  0xe5   :  { %v271_v31 = vrot.slane %v263_v30, %v262_v29  ;;  %v264_v33 = vcombine.high %v263_v30, %v263_v30 }
  0xe6   :  { %v232_v50 = vrot.slane %v225_v47, %v2248_v45  ;;  %v207_v51 = vcombine.high %v205_v48, %v205_v48  ;;  %v234_v52 = vcombine.low %v198_v44, %v206_v49 }
  0xe7   :  { %v2290_v34 = vrot.slane %v271_v31, %v281_v32  ;;  %v278_v35 = vrot.slane %v264_v33, %v262_v29 }
  0xe8   :  { %v243_v54 = vcombine.low %v205_v48, %v207_v51  ;;  %v297_v55 = vcombine.low %v223_v53, %v232_v50  ;;  %v241_v56 = vrot.slane %v234_v52, %v2248_v45  ;;  %v1763_v58 = vcombine.high %v223_v53, %v232_v50 }
  0xe9   :  { %v2293_v38 = vrot.slane %v278_v35, %v281_v32 }
  0xea   :  { %v250_v57 = vrot.slane %v243_v54, %v2248_v45  ;;  %v305_v61 = vrot.slane %v297_v55, %v2182_v8  ;;  %v322_v0 = vrot.slane %v1763_v58, %v2182_v8 }
  0xec   :  { %v298_v59 = vcombine.low %v241_v56, %v250_v57  ;;  %v1764_v60 = vcombine.high %v241_v56, %v250_v57 }
  0xee   :  { %v312_v62 = vrot.slane %v298_v59, %v2182_v8  ;;  %v329_v63 = vrot.slane %v1764_v60, %v2182_v8 }
  0xf0   :  { %v313_v2 = vcombine.low %v305_v61, %v312_v62  ;;  %v330_v3 = vcombine.low %v322_v0, %v329_v63 }
  0xf2   :  { %v2259_v4 = vpack.c.bf16 %v313_v2, %v313_v2  ;;  %v2262_v6 = vpack.c.bf16 %v330_v3, %v330_v3 }
  0xf4   :  { %336 = vrot.lane.b32.xlu0 %v2259_v4, %s2090_s3 }
  0xf8   :  { %386 = vrot.lane.b32.xlu0 %v2262_v6, %s2090_s3 }
  0xfc   :  { %454 = vrot.lane.b32.xlu0 %v2259_v4, %s2084_s16 }
 0x100   :  { %559 = vrot.lane.b32.xlu0 %v2259_v4, %s2091_s6 }
 0x104   :  { %609 = vrot.lane.b32.xlu0 %v2262_v6, %s2091_s6 }
 0x108   :  { %557 = vrot.lane.b32.xlu0 %v2259_v4, %s2092_s20 }
 0x10c   :  { %607 = vrot.lane.b32.xlu0 %v2262_v6, %s2092_s20 }
 0x166   :  { %v337_v7 = vpop.permute.xlu0 %336 }
 0x167   :  { %v343_v15 = vsel %vm338_vm2, %v337_v7, 0 }
 0x168   :  { %1850 = vmatpush3.bf16.xpose.msra.mxu1 %v343_v15 }
 0x169   :  { %1861 = vmatprep.subr.bf16.mxu1 %v2086_v1 }
 0x16a   :  { %v387_v18 = vpop.permute.xlu0 %386 }
 0x16b   :  { %v392_v19 = vsel %vm338_vm2, %v387_v18, 0 }
 0x16c   :  { %1856 = vmatpush3.bf16.xpose.msra.mxu0 %v392_v19 }
 0x16d   :  { %1867 = vmatprep.subr.bf16.mxu0 %v2086_v1 }
 0x16e   :  { %v455_v20 = vpop.permute.xlu0 %454 }
 0x16f   :  { %v461_v21 = vsel %vm459_vm3, %v455_v20, 0  ;;  %1852 = vmatmul.mubr.msk.bf16.vlgmr.msra.gmra.mxu1 %vm338_vm2, %v2259_v4 }
 0x170   :  { %1862 = vmatpush3.bf16.msra.mxu1 %v461_v21  ;;  %1863 = vmatprep.mubr.msk.bf16.mxu1 %vm2087_vm0, %v2086_v1 }
 0x171   :  { %1873 = vmatprep.subr.bf16.mxu1 %v2086_v1 }
 0x172   :  { %v560_v57 = vpop.permute.xlu0 %559 }
 0x173   :  { %1858 = vmatmul.mubr.msk.bf16.vlgmr.msra.gmra.mxu0 %vm338_vm2, %v2262_v6  ;;  %v565_v61 = vsel %vm338_vm2, %v560_v57, 0 }
 0x174   :  { %1869 = vmatprep.mubr.msk.bf16.mxu0 %vm2087_vm0, %v2086_v1 }
 0x176   :  { %v610_v60 = vpop.permute.xlu0 %609 }
 0x177   :  { %v615_v0 = vsel %vm338_vm2, %v610_v60, 0 }
 0x17a   :  { %v558_v2 = vpop.permute.xlu0 %557 }
 0x17e   :  { %v608_v3 = vpop.permute.xlu0 %607 }
 0x22f   :  { %v379_v36 = vpop.f32.mrf.mxu1 }
 0x230   :  { %v380_v37 = vadd.f32 %v379_v36, %v2290_v34 }
 0x231   :  { %v1853_v39 = vpop.f32.mrf.mxu1 }
 0x232   :  { %v434_v40 = vsel %vm338_vm2, %v380_v37, -inf }
 0x233   :  { %435 = vmax.xlane.f32.xlu1 %v434_v40  ;;  %v382_v41 = vpop.f32.mrf.mxu1  ;;  %v428_v42 = vpop.f32.mrf.mxu0 }
 0x234   :  { %v429_v43 = vadd.f32 %v428_v42, %v2293_v38 }
 0x235   :  { %v1854_v44 = vpop.f32.mrf.mxu1  ;;  %v1859_v46 = vpop.f32.mrf.mxu0 }
 0x236   :  { %v437_v5 = vsel %vm338_vm2, %v429_v43, -inf }
 0x237   :  { %438 = vmax.xlane.f32.xlu1 %v437_v5  ;;  %v431_v47 = vpop.f32.mrf.mxu0 }
 0x239   :  { %v1860_v48 = vpop.f32.mrf.mxu0 }
 0x248   :  { %503 = vrot.lane.b32.xlu1 %v2262_v6, %s2084_s16  ;;  %s2095_s16 = smov 80  }
 0x2bc   :  { %v436_v49 = vpop.xlane.xlu1 %435 }
 0x2bd   :  { %v440_v50 = vsub.f32 %v380_v37, %v436_v49 }
 0x2bf   :  { %v442_v51 = vmul.f32 1.442695, %v440_v50 }
 0x2c0   :  { %v439_v52 = vpop.xlane.xlu1 %438 }
 0x2c1   :  { %2007 = vpow2.f32 %v442_v51  ;;  %v441_v53 = vsub.f32 %v429_v43, %v439_v52 }
 0x2c3   :  { %v444_v54 = vmul.f32 1.442695, %v441_v53 }
 0x2c4   :  { %v504_v55 = vpop.permute.xlu1 %503 }
 0x2c5   :  { %2009 = vpow2.f32 %v444_v54  ;;  %v509_v56 = vsel %vm459_vm3, %v504_v55, 0 }
 0x2c6   :  { %1868 = vmatpush3.bf16.msra.mxu0 %v509_v56 }
 0x2c7   :  { %1879 = vmatprep.subr.bf16.mxu0 %v2086_v1 }
 0x2ce   :  { %v2302_v58 = vpop.eup %2007 }
 0x2cf   :  { %v452_v59 = vpack.c.bf16 %v2302_v58, %v2302_v58 }
 0x2d1   :  { %1864 = vmatmul.mubr.msk.bf16.vlgmr.msra.gmra.mxu1 %vm338_vm2, %v452_v59 }
 0x2d2   :  { %v2308_v62 = vpop.eup %2009  ;;  %1874 = vmatpush3.bf16.xpose.msra.mxu1 %v565_v61  ;;  %1875 = vmatprep.mubr.msk.bf16.mxu1 %vm2087_vm0, %v2086_v1 }
 0x2d3   :  { %v453_v63 = vpack.c.bf16 %v2308_v62, %v2308_v62  ;;  %1885 = vmatprep.subr.bf16.mxu1 %v2086_v1 }
 0x2d5   :  { %1870 = vmatmul.mubr.msk.bf16.vlgmr.msra.gmra.mxu0 %vm338_vm2, %v453_v63 }
 0x2d6   :  { %1880 = vmatpush3.bf16.xpose.msra.mxu0 %v615_v0  ;;  %1881 = vmatprep.mubr.msk.bf16.mxu0 %vm2087_vm0, %v2086_v1 }
 0x2d7   :  { %1891 = vmatprep.subr.bf16.mxu0 %v2086_v1 }
 0x2d9   :  { %1876 = vmatmul.mubr.msk.bf16.vlgmr.msra.gmra.mxu1 %vm338_vm2, %v558_v2 }
 0x2da   :  { %1887 = vmatprep.mubr.msk.bf16.mxu1 %vm2087_vm0, %v2086_v1 }
 0x2dd   :  { %1882 = vmatmul.mubr.msk.bf16.vlgmr.msra.gmra.mxu0 %vm338_vm2, %v608_v3 }
 0x2de   :  { %1893 = vmatprep.mubr.msk.bf16.mxu0 %vm2087_vm0, %v2086_v1 }
 0x391   :  { %v2326_v7 = vpop.f32.mrf.mxu1 }
 0x393   :  { %v1865_v15 = vpop.f32.mrf.mxu1 }
 0x395   :  { %v500_v18 = vpop.f32.mrf.mxu1  ;;  %v2328_v19 = vpop.f32.mrf.mxu0 }
 0x397   :  { %v1866_v20 = vpop.f32.mrf.mxu1  ;;  %v1871_v21 = vpop.f32.mrf.mxu0 }
 0x399   :  { %v548_v22 = vpop.f32.mrf.mxu0  ;;  %v601_v23 = vpop.f32.mrf.mxu1 }
 0x39a   :  { %v602_v24 = vadd.f32 %v601_v23, %v2290_v34 }
 0x39b   :  { %v1872_v25 = vpop.f32.mrf.mxu0  ;;  %v1877_v26 = vpop.f32.mrf.mxu1 }
 0x39c   :  { %v657_v27 = vsel %vm338_vm2, %v602_v24, -inf }
 0x39d   :  { %v604_v28 = vpop.f32.mrf.mxu1  ;;  %658 = vmax.xlane.f32.xlu1 %v657_v27  ;;  %v651_v29 = vpop.f32.mrf.mxu0 }
 0x39e   :  { %v652_v30 = vadd.f32 %v651_v29, %v2293_v38 }
 0x39f   :  { %v1878_v31 = vpop.f32.mrf.mxu1  ;;  %v1883_v32 = vpop.f32.mrf.mxu0 }
 0x3a0   :  { %v660_v33 = vsel %vm338_vm2, %v652_v30, -inf }
 0x3a1   :  { %661 = vmax.xlane.f32.xlu0 %v660_v33  ;;  %v654_v35 = vpop.f32.mrf.mxu0 }
 0x3a3   :  { %v1884_v36 = vpop.f32.mrf.mxu0 }
 0x3ae   :  { %725 = vrot.lane.b32.xlu1 %v2262_v6, %s2094_s1 }
 0x3b2   :  { %790 = vrot.lane.b32.xlu1 %v2259_v4, %s2095_s16 }
 0x3b6   :  { %788 = vrot.lane.b32.xlu1 %v2259_v4, %s2096_s23 }
 0x3b7   :  { %677 = vrot.lane.b32.xlu0 %v2259_v4, %s2094_s1 }
 0x3bb   :  { %840 = vrot.lane.b32.xlu0 %v2262_v6, %s2095_s16 }
 0x3bf   :  { %838 = vrot.lane.b32.xlu0 %v2262_v6, %s2096_s23 }
 0x426   :  { %v659_v37 = vpop.xlane.xlu1 %658 }
 0x427   :  { %v663_v39 = vsub.f32 %v602_v24, %v659_v37 }
 0x429   :  { %v665_v40 = vmul.f32 1.442695, %v663_v39 }
 0x42a   :  { %v726_v41 = vpop.permute.xlu1 %725  ;;  %v662_v42 = vpop.xlane.xlu0 %661 }
 0x42b   :  { %2011 = vpow2.f32 %v665_v40  ;;  %v731_v43 = vsel %vm459_vm3, %v726_v41, 0  ;;  %v664_v44 = vsub.f32 %v652_v30, %v662_v42 }
 0x42c   :  { %1892 = vmatpush3.bf16.msra.mxu0 %v731_v43 }
 0x42d   :  { %v667_v46 = vmul.f32 1.442695, %v664_v44  ;;  %1903 = vmatprep.subr.bf16.mxu0 %v2086_v1 }
 0x42e   :  { %v678_v5 = vpop.permute.xlu0 %677  ;;  %v791_v49 = vpop.permute.xlu1 %790 }
 0x42f   :  { %2013 = vpow2.f32 %v667_v46  ;;  %v683_v47 = vsel %vm459_vm3, %v678_v5, 0  ;;  %v796_v51 = vsel %vm338_vm2, %v791_v49, 0 }
 0x430   :  { %1886 = vmatpush3.bf16.msra.mxu1 %v683_v47 }
 0x431   :  { %1897 = vmatprep.subr.bf16.mxu1 %v2086_v1 }
 0x432   :  { %v841_v53 = vpop.permute.xlu0 %840  ;;  %v789_v56 = vpop.permute.xlu1 %788 }
 0x433   :  { %v846_v55 = vsel %vm338_vm2, %v841_v53, 0 }
 0x436   :  { %v839_v57 = vpop.permute.xlu0 %838 }
 0x438   :  { %v2344_v48 = vpop.eup %2011 }
 0x439   :  { %v675_v50 = vpack.c.bf16 %v2344_v48, %v2344_v48 }
 0x43b   :  { %1888 = vmatmul.mubr.msk.bf16.vlgmr.msra.gmra.mxu1 %vm338_vm2, %v675_v50 }
 0x43c   :  { %v2350_v52 = vpop.eup %2013  ;;  %1898 = vmatpush3.bf16.xpose.msra.mxu1 %v796_v51  ;;  %1899 = vmatprep.mubr.msk.bf16.mxu1 %vm2087_vm0, %v2086_v1 }
 0x43d   :  { %v676_v54 = vpack.c.bf16 %v2350_v52, %v2350_v52  ;;  %1909 = vmatprep.subr.bf16.mxu1 %v2086_v1 }
 0x43f   :  { %1894 = vmatmul.mubr.msk.bf16.vlgmr.msra.gmra.mxu0 %vm338_vm2, %v676_v54 }
 0x440   :  { %1904 = vmatpush3.bf16.xpose.msra.mxu0 %v846_v55  ;;  %1905 = vmatprep.mubr.msk.bf16.mxu0 %vm2087_vm0, %v2086_v1 }
 0x441   :  { %1915 = vmatprep.subr.bf16.mxu0 %v2086_v1 }
 0x443   :  { %1900 = vmatmul.mubr.msk.bf16.vlgmr.msra.gmra.mxu1 %vm338_vm2, %v789_v56 }
 0x444   :  { %1911 = vmatprep.mubr.msk.bf16.mxu1 %vm2087_vm0, %v2086_v1 }
 0x447   :  { %1906 = vmatmul.mubr.msk.bf16.vlgmr.msra.gmra.mxu0 %vm338_vm2, %v839_v57 }
 0x448   :  { %1917 = vmatprep.mubr.msk.bf16.mxu0 %vm2087_vm0, %v2086_v1 }
 0x4fb   :  { %v2368_v59 = vpop.f32.mrf.mxu1 }
 0x4fd   :  { %v1889_v60 = vpop.f32.mrf.mxu1 }
 0x4ff   :  { %v722_v61 = vpop.f32.mrf.mxu1  ;;  %v2370_v63 = vpop.f32.mrf.mxu0 }
 0x501   :  { %v1890_v0 = vpop.f32.mrf.mxu1  ;;  %v1895_v2 = vpop.f32.mrf.mxu0 }
 0x503   :  { %v770_v3 = vpop.f32.mrf.mxu0  ;;  %v832_v15 = vpop.f32.mrf.mxu1 }
 0x504   :  { %v833_v18 = vadd.f32 %v832_v15, %v2290_v34 }
 0x505   :  { %v1896_v20 = vpop.f32.mrf.mxu0  ;;  %v1901_v21 = vpop.f32.mrf.mxu1 }
 0x506   :  { %v888_v22 = vsel %vm338_vm2, %v833_v18, -inf }
 0x507   :  { %889 = vmax.xlane.f32.xlu1 %v888_v22  ;;  %v835_v23 = vpop.f32.mrf.mxu1  ;;  %v882_v24 = vpop.f32.mrf.mxu0 }
 0x508   :  { %v883_v25 = vadd.f32 %v882_v24, %v2293_v38 }
 0x509   :  { %v1902_v26 = vpop.f32.mrf.mxu1  ;;  %v1907_v27 = vpop.f32.mrf.mxu0 }
 0x50a   :  { %v891_v28 = vsel %vm338_vm2, %v883_v25, -inf }
 0x50b   :  { %892 = vmax.xlane.f32.xlu0 %v891_v28  ;;  %v885_v29 = vpop.f32.mrf.mxu0 }
 0x50d   :  { %v1908_v30 = vpop.f32.mrf.mxu0 }
 0x518   :  { %956 = vrot.lane.b32.xlu1 %v2262_v6, %s2097_s24 }
 0x51c   :  { %1021 = vrot.lane.b32.xlu1 %v2259_v4, %s2098_s25 }
 0x520   :  { %1019 = vrot.lane.b32.xlu1 %v2259_v4, %s2099_s26 }
 0x521   :  { %908 = vrot.lane.b32.xlu0 %v2259_v4, %s2097_s24 }
 0x525   :  { %1071 = vrot.lane.b32.xlu0 %v2262_v6, %s2098_s25 }
 0x529   :  { %1069 = vrot.lane.b32.xlu0 %v2262_v6, %s2099_s26 }
 0x590   :  { %v890_v31 = vpop.xlane.xlu1 %889 }
 0x591   :  { %v894_v32 = vsub.f32 %v833_v18, %v890_v31 }
 0x593   :  { %v896_v33 = vmul.f32 1.442695, %v894_v32 }
 0x594   :  { %v957_v35 = vpop.permute.xlu1 %956  ;;  %v893_v36 = vpop.xlane.xlu0 %892 }
 0x595   :  { %2015 = vpow2.f32 %v896_v33  ;;  %v962_v37 = vsel %vm459_vm3, %v957_v35, 0  ;;  %v895_v39 = vsub.f32 %v883_v25, %v893_v36 }
 0x596   :  { %1916 = vmatpush3.bf16.msra.mxu0 %v962_v37 }
 0x597   :  { %v898_v40 = vmul.f32 1.442695, %v895_v39  ;;  %1927 = vmatprep.subr.bf16.mxu0 %v2086_v1 }
 0x598   :  { %v909_v41 = vpop.permute.xlu0 %908  ;;  %v1022_v44 = vpop.permute.xlu1 %1021 }
 0x599   :  { %2017 = vpow2.f32 %v898_v40  ;;  %v914_v42 = vsel %vm459_vm3, %v909_v41, 0  ;;  %v1027_v5 = vsel %vm338_vm2, %v1022_v44, 0  ;;  %v446_v44 = vsel %vm338_vm2, %v2302_v58, 0.0 }
 0x59a   :  { %1910 = vmatpush3.bf16.msra.mxu1 %v914_v42 }
 0x59b   :  { %1921 = vmatprep.subr.bf16.mxu1 %v2086_v1 }
 0x59c   :  { %v1072_v49 = vpop.permute.xlu0 %1071  ;;  %v1020_v53 = vpop.permute.xlu1 %1019 }
 0x59d   :  { %v1077_v51 = vsel %vm338_vm2, %v1072_v49, 0 }
 0x5a0   :  { %v1070_v54 = vpop.permute.xlu0 %1069 }
 0x5a2   :  { %v2016_v43 = vpop.eup %2015 }
 0x5a3   :  { %v906_v46 = vpack.c.bf16 %v2016_v43, %v2016_v43  ;;  %v900_v31 = vsel %vm338_vm2, %v2016_v43, 0.0 }
 0x5a5   :  { %1912 = vmatmul.mubr.msk.bf16.vlgmr.msra.gmra.mxu1 %vm338_vm2, %v906_v46 }
 0x5a6   :  { %v2018_v47 = vpop.eup %2017  ;;  %1922 = vmatpush3.bf16.xpose.msra.mxu1 %v1027_v5  ;;  %1923 = vmatprep.mubr.msk.bf16.mxu1 %vm2087_vm0, %v2086_v1 }
 0x5a7   :  { %v907_v50 = vpack.c.bf16 %v2018_v47, %v2018_v47  ;;  %1933 = vmatprep.subr.bf16.mxu1 %v2086_v1  ;;  %v903_v30 = vsel %vm338_vm2, %v2018_v47, 0.0  ;;  %v449_v47 = vsel %vm338_vm2, %v2308_v62, 0.0 }
 0x5a9   :  { %1918 = vmatmul.mubr.msk.bf16.vlgmr.msra.gmra.mxu0 %vm338_vm2, %v907_v50 }
 0x5aa   :  { %1928 = vmatpush3.bf16.xpose.msra.mxu0 %v1077_v51  ;;  %1929 = vmatprep.mubr.msk.bf16.mxu0 %vm2087_vm0, %v2086_v1 }
 0x5ab   :  { %1939 = vmatprep.subr.bf16.mxu0 %v2086_v1 }
 0x5ad   :  { %1924 = vmatmul.mubr.msk.bf16.vlgmr.msra.gmra.mxu1 %vm338_vm2, %v1020_v53 }
 0x5ae   :  { %1935 = vmatprep.mubr.msk.bf16.mxu1 %vm2087_vm0, %v2086_v1 }
 0x5b1   :  { %1930 = vmatmul.mubr.msk.bf16.vlgmr.msra.gmra.mxu0 %vm338_vm2, %v1070_v54 }
 0x5b2   :  { %1941 = vmatprep.mubr.msk.bf16.mxu0 %vm2087_vm0, %v2086_v1 }
 0x665   :  { %v2402_v55 = vpop.f32.mrf.mxu1 }
 0x667   :  { %v1913_v56 = vpop.f32.mrf.mxu1 }
 0x669   :  { %v953_v57 = vpop.f32.mrf.mxu1  ;;  %v2404_v60 = vpop.f32.mrf.mxu0 }
 0x66b   :  { %v1914_v61 = vpop.f32.mrf.mxu1  ;;  %v1919_v0 = vpop.f32.mrf.mxu0 }
 0x66d   :  { %v1001_v2 = vpop.f32.mrf.mxu0  ;;  %v1063_v3 = vpop.f32.mrf.mxu1 }
 0x66e   :  { %v1064_v15 = vadd.f32 %v1063_v3, %v2290_v34  ;;  %v669_v34 = vsel %vm338_vm2, %v2344_v48, 0.0 }
 0x66f   :  { %v1920_v18 = vpop.f32.mrf.mxu0  ;;  %v1925_v20 = vpop.f32.mrf.mxu1 }
 0x670   :  { %v1119_v21 = vsel %vm338_vm2, %v1064_v15, -inf }
 0x671   :  { %1120 = vmax.xlane.f32.xlu1 %v1119_v21  ;;  %v1066_v22 = vpop.f32.mrf.mxu1  ;;  %v1113_v23 = vpop.f32.mrf.mxu0 }
 0x672   :  { %v1114_v24 = vadd.f32 %v1113_v23, %v2293_v38  ;;  %v672_v38 = vsel %vm338_vm2, %v2350_v52, 0.0 }
 0x673   :  { %v1926_v25 = vpop.f32.mrf.mxu1  ;;  %v1931_v26 = vpop.f32.mrf.mxu0 }
 0x674   :  { %v1122_v27 = vsel %vm338_vm2, %v1114_v24, -inf }
 0x675   :  { %1123 = vmax.xlane.f32.xlu0 %v1122_v27  ;;  %v1116_v28 = vpop.f32.mrf.mxu0 }
 0x677   :  { %v1932_v29 = vpop.f32.mrf.mxu0 }
 0x682   :  { %1187 = vrot.lane.b32.xlu1 %v2262_v6, %s2100_s27 }
 0x68b   :  { %1139 = vrot.lane.b32.xlu0 %v2259_v4, %s2100_s27 }
 0x6a6   :  { %670 = vadd.xlane.f32.xlu1 %v669_v34 }
 0x6aa   :  { %904 = vadd.xlane.f32.xlu1 %v903_v30  ;;  %673 = vadd.xlane.f32.xlu0 %v672_v38 }
 0x6ae   :  { %901 = vadd.xlane.f32.xlu0 %v900_v31 }
 0x6fa   :  { %v1121_v32 = vpop.xlane.xlu1 %1120 }
 0x6fb   :  { %v1125_v33 = vsub.f32 %v1064_v15, %v1121_v32 }
 0x6fd   :  { %v1127_v35 = vmul.f32 1.442695, %v1125_v33 }
 0x6fe   :  { %v1188_v6 = vpop.permute.xlu1 %1187  ;;  %v1124_v36 = vpop.xlane.xlu0 %1123 }
 0x6ff   :  { %2019 = vpow2.f32 %v1127_v35  ;;  %v1193_v4 = vsel %vm459_vm3, %v1188_v6, 0  ;;  %v1126_v48 = vsub.f32 %v1114_v24, %v1124_v36 }
 0x700   :  { %1940 = vmatpush3.bf16.msra.mxu0 %v1193_v4 }
 0x701   :  { %v1129_v37 = vmul.f32 1.442695, %v1126_v48  ;;  %1953 = vmatprep.subr.bf16.mxu0 %v2086_v1 }
 0x702   :  { %v1140_v39 = vpop.permute.xlu0 %1139 }
 0x703   :  { %2021 = vpow2.f32 %v1129_v37  ;;  %v1145_v52 = vsel %vm459_vm3, %v1140_v39, 0 }
 0x704   :  { %1934 = vmatpush3.bf16.msra.mxu1 %v1145_v52 }
 0x705   :  { %1945 = vmatprep.subr.bf16.mxu1 %v2086_v1 }
 0x70c   :  { %v2020_v40 = vpop.eup %2019 }
 0x70d   :  { %v1131_v41 = vsel %vm338_vm2, %v2020_v40, 0.0  ;;  %v1137_v42 = vpack.c.bf16 %v2020_v40, %v2020_v40 }
 0x70e   :  { %1132 = vadd.xlane.f32.xlu0 %v1131_v41 }
 0x70f   :  { %1936 = vmatmul.mubr.msk.bf16.vlgmr.msra.gmra.mxu1 %vm338_vm2, %v1137_v42 }
 0x710   :  { %v2022_v43 = vpop.eup %2021  ;;  %1949 = vmatprep.mubr.msk.bf16.mxu1 %vm2087_vm0, %v2086_v1 }
 0x711   :  { %v1134_v46 = vsel %vm338_vm2, %v2022_v43, 0.0  ;;  %v1138_v5 = vpack.c.bf16 %v2022_v43, %v2022_v43 }
 0x712   :  { %447 = vadd.xlane.f32.xlu0 %v446_v44  ;;  %1135 = vadd.xlane.f32.xlu1 %v1134_v46 }
 0x713   :  { %1942 = vmatmul.mubr.msk.bf16.vlgmr.msra.gmra.mxu0 %vm338_vm2, %v1138_v5 }
 0x714   :  { %1957 = vmatprep.mubr.msk.bf16.mxu0 %vm2087_vm0, %v2086_v1 }
 0x716   :  { %450 = vadd.xlane.f32.xlu1 %v449_v47 }
 0x72f   :  { %v671_v49 = vpop.xlane.xlu1 %670 }
 0x730   :  { %2023 = vrcp.f32 %v671_v49 }
 0x733   :  { %v905_v50 = vpop.xlane.xlu1 %904  ;;  %v674_v51 = vpop.xlane.xlu0 %673 }
 0x734   :  { %2025 = vrcp.f32 %v905_v50 }
 0x735   :  { %2027 = vrcp.f32 %v674_v51 }
 0x737   :  { %v902_v58 = vpop.xlane.xlu0 %901 }
 0x738   :  { %2029 = vrcp.f32 %v902_v58 }
 0x73d   :  { %v2024_v53 = vpop.eup %2023 }
 0x73e   :  { %v775_v54 = vmul.f32 %v2024_v53, %v2368_v59 }
 0x740   :  { %779 = vrot.lane.b32.xlu0 %v775_v54, %s2101_s28 }
 0x741   :  { %v2026_v56 = vpop.eup %2025 }
 0x742   :  { %v2028_v57 = vpop.eup %2027  ;;  %v1007_v61 = vmul.f32 %v2026_v56, %v2404_v60 }
 0x743   :  { %v776_v62 = vmul.f32 %v2028_v57, %v2370_v63 }
 0x744   :  { %1012 = vrot.lane.b32.xlu0 %v1007_v61, %s2102_s2 }
 0x745   :  { %v2030_v0 = vpop.eup %2029  ;;  %781 = vrot.lane.b32.xlu1 %v776_v62, %s2101_s28 }
 0x746   :  { %v1006_v2 = vmul.f32 %v2030_v0, %v2402_v55 }
 0x749   :  { %1010 = vrot.lane.b32.xlu1 %v1006_v2, %s2102_s2 }
 0x797   :  { %v1133_v3 = vpop.xlane.xlu0 %1132 }
 0x79b   :  { %v1136_v15 = vpop.xlane.xlu1 %1135  ;;  %v448_v18 = vpop.xlane.xlu0 %447 }
 0x79c   :  { %2031 = vrcp.f32 %v448_v18 }
 0x79f   :  { %v451_v59 = vpop.xlane.xlu1 %450 }
 0x7a0   :  { %2033 = vrcp.f32 %v451_v59 }
 0x7a1   :  { %2035 = vrcp.f32 %v1133_v3 }
 0x7a2   :  { %2037 = vrcp.f32 %v1136_v15 }
 0x7a9   :  { %v2032_v20 = vpop.eup %2031 }
 0x7aa   :  { %v553_v21 = vmul.f32 %v2032_v20, %v2326_v7  ;;  %v1999_v7 = vld [vmem:[%s2540_s4 + $0x8] sm:$0xff]  }
 0x7ab   :  { %1946 = vmatpush3.bf16.msra.mxu1 %v1999_v7 }
 0x7ac   :  { %555 = vst.msk [vmem:[#allocation2] sm:$0xff] %vm338_vm2, %v553_v21  ;;  %1947 = vmatprep.subr.bf16.mxu1 %v2086_v1  ;;  %v2001_v21 = vld [vmem:[#allocation3 + $0x8] sm:$0xff]  }
 0x7ad   :  { %v2034_v22 = vpop.eup %2033  ;;  %1954 = vmatpush3.bf16.msra.mxu0 %v2001_v21 }
 0x7ae   :  { %v554_v63 = vmul.f32 %v2034_v22, %v2328_v19  ;;  %v2000_v19 = vld [vmem:[%s2540_s4] sm:$0xff]   ;;  %v2036_v25 = vpop.eup %2035  ;;  %1955 = vmatprep.subr.bf16.mxu0 %v2086_v1  ;;  %v2002_v22 = vld [vmem:[#allocation3] sm:$0xff]  }
 0x7af   :  { %1948 = vmatpush3.bf16.msra.mxu1 %v2000_v19  ;;  %v2038_v29 = vpop.eup %2037 }
 0x7b0   :  { %556 = vst.msk [vmem:[#allocation2 + $0x8] sm:$0xff] %vm338_vm2, %v554_v63  ;;  %1961 = vmatprep.subr.bf16.mxu1 %v2086_v1  ;;  %v2003_v63 = vld [vmem:[%s2544_s8 + $0x18] sm:$0xff]  }
 0x7b1   :  { %1956 = vmatpush3.bf16.msra.mxu0 %v2002_v22 }
 0x7b2   :  { %v780_v60 = vpop.permute.xlu0 %779 }
 0x7b3   :  { %786 = vst.msk [vmem:[#allocation2] sm:$0xff] %vm785_vm4, %v780_v60  ;;  %v1781_v60 = vld [vmem:[%s2541_s5] ss:$0 sm:$0xff] }
 0x7b6   :  { %v1013_v55 = vpop.permute.xlu0 %1012 }
 0x7b7   :  { %v782_v23 = vpop.permute.xlu1 %781 }
 0x7b8   :  { %787 = vst.msk [vmem:[#allocation2 + $0x8] sm:$0xff] %vm785_vm4, %v782_v23 }
 0x7b9   :  { %1018 = vst.msk [vmem:[#allocation2 + $0x8] sm:$0xff] %vm1016_vm5, %v1013_v55 }
 0x7bb   :  { %v1011_v24 = vpop.permute.xlu1 %1010 }
 0x7bc   :  { %1017 = vst.msk [vmem:[#allocation2] sm:$0xff] %vm1016_vm5, %v1011_v24 }
 0x7cf   :  { %v1181_v26 = vpop.f32.mrf.mxu1 }
 0x7d0   :  { %v1237_v27 = vmul.f32 %v2036_v25, %v1181_v26 }
 0x7d1   :  { %v1937_v28 = vpop.f32.mrf.mxu1 }
 0x7d2   :  { %1241 = vrot.lane.b32.xlu1 %v1237_v27, %s2103_s13 }
 0x7d3   :  { %v1184_v34 = vpop.f32.mrf.mxu1  ;;  %v1229_v30 = vpop.f32.mrf.mxu0 }
 0x7d4   :  { %v1238_v38 = vmul.f32 %v2038_v29, %v1229_v30 }
 0x7d5   :  { %v1938_v31 = vpop.f32.mrf.mxu1  ;;  %v1943_v32 = vpop.f32.mrf.mxu0 }
 0x7d6   :  { %1243 = vrot.lane.b32.xlu0 %v1238_v38, %s2103_s13 }
 0x7d7   :  { %v1232_v33 = vpop.f32.mrf.mxu0 }
 0x7d9   :  { %v1944_v35 = vpop.f32.mrf.mxu0 }
 0x844   :  { %v1242_v6 = vpop.permute.xlu1 %1241 }
 0x845   :  { %1248 = vst.msk [vmem:[#allocation2] sm:$0xff] %vm1247_vm6, %v1242_v6 }
 0x848   :  { %v1244_v36 = vpop.permute.xlu0 %1243 }
 0x849   :  { %1249 = vst.msk [vmem:[#allocation2 + $0x8] sm:$0xff] %vm1247_vm6, %v1244_v36 }
 0x84c   :  { %v1250_v4 = vld [vmem:[#allocation2] sm:$0xff] }
 0x84d   :  { %v1252_v48 = vcombine.high %v1250_v4, %v2086_v1  ;;  %v1259_v39 = vrot.slane %v1250_v4, %v2182_v8 }
 0x84f   :  { %v1266_v41 = vrot.slane %v1252_v48, %v2182_v8 }
 0x850   :  { %v1251_v37 = vld [vmem:[#allocation2 + $0x8] sm:$0xff] }
 0x851   :  { %v1267_v52 = vcombine.high %v1251_v37, %v2086_v1  ;;  %v1274_v40 = vrot.slane %v1251_v37, %v2182_v8 }
 0x853   :  { %v1281_v42 = vrot.slane %v1267_v52, %v2182_v8  ;;  %v1282_v43 = vcombine.low %v1259_v39, %v1274_v40  ;;  %v1283_v44 = vcombine.high %v1259_v39, %v1274_v40 }
 0x855   :  { %v1290_v46 = vrot.slane %v1282_v43, %v2248_v45  ;;  %v1297_v5 = vrot.slane %v1283_v44, %v2248_v45  ;;  %v1298_v47 = vcombine.low %v1266_v41, %v1281_v42  ;;  %v1299_v49 = vcombine.high %v1266_v41, %v1281_v42 }
 0x857   :  { %v1306_v50 = vrot.slane %v1298_v47, %v2248_v45  ;;  %v1313_v51 = vrot.slane %v1299_v49, %v2248_v45  ;;  %v1314_v58 = vcombine.high %v1290_v46, %v2086_v1  ;;  %v1315_v53 = vcombine.high %v1297_v5, %v2086_v1 }
 0x859   :  { %v1316_v54 = vcombine.high %v1306_v50, %v2086_v1  ;;  %v1317_v56 = vcombine.high %v1313_v51, %v2086_v1  ;;  %v1326_v57 = vcombine.low %v1290_v46, %v1314_v58  ;;  %v1327_v61 = vcombine.low %v1297_v5, %v1315_v53  ;;  %v2006_v46 = vld [vmem:[%s2544_s8] sm:$0xff]  }
 0x85a   :  { %v1785_v5 = vld [vmem:[%s2543_s7] ss:$0 sm:$0xff]  ;;  %s2104_s7 = smov [#allocation6]  }
 0x85b   :  { %v1334_v62 = vrot.slane %v1326_v57, %v2182_v8  ;;  %v1341_v0 = vrot.slane %v1327_v61, %v2182_v8  ;;  %v1343_v2 = vcombine.low %v1306_v50, %v1316_v54  ;;  %v1344_v3 = vcombine.low %v1313_v51, %v1317_v56 }
 0x85d   :  { %v1351_v15 = vrot.slane %v1343_v2, %v2182_v8  ;;  %v1358_v45 = vrot.slane %v1344_v3, %v2182_v8  ;;  %v1342_v18 = vcombine.low %v1334_v62, %v1341_v0 }
 0x85f   :  { %v1359_v59 = vcombine.low %v1351_v15, %v1358_v45 }
 0x861   :  { %v1362_v20 = vpack.c.bf16 %v1359_v59, %v1342_v18 }
 0x863   :  { %1950 = vmatmul.mubr.msk.bf16.vlgmr.msra.gmra.mxu1 %vm127_vm1, %v1362_v20 }
 0x864   :  { %1969 = vmatprep.mubr.msk.bf16.mxu1 %vm2087_vm0, %v2086_v1  ;;  %1962 = vmatpush3.bf16.msra.mxu1 %v2003_v63 }
 0x865   :  { %1963 = vmatprep.subr.bf16.mxu1 %v2086_v1 }
 0x923   :  { %v1423_v55 = vpop.f32.mrf.mxu1 }
 0x924   :  { %v1424_v23 = vadd.f32 %v1781_v60, %v1423_v55 }
 0x925   :  { %v1951_v24 = vpop.f32.mrf.mxu1 }
 0x926   :  { %v1432_v7 = vcombine.high %v1424_v23, %v1424_v23  ;;  %v1439_v19 = vrot.slane %v1424_v23, %v2182_v8 }
 0x927   :  { %v1426_v25 = vpop.f32.mrf.mxu1 }
 0x928   :  { %v1446_v26 = vrot.slane %v1432_v7, %v2182_v8  ;;  %v1447_v27 = vcombine.high %v1439_v19, %v1439_v19  ;;  %v1427_v28 = vadd.f32 %v1781_v60, %v1426_v25  ;;  %v1474_v36 = vadd.f32 %v1439_v19, %v2187_v9 }
 0x929   :  { %v1952_v29 = vpop.f32.mrf.mxu1 }
 0x92a   :  { %v1448_v34 = vcombine.high %v1446_v26, %v1446_v26  ;;  %v1449_v30 = vcombine.high %v1427_v28, %v1427_v28  ;;  %v1456_v38 = vrot.slane %v1427_v28, %v2182_v8  ;;  %v1475_v31 = vadd.f32 %v1447_v27, %v2192_v10 }
 0x92b   :  { %v1476_v32 = vadd.f32 %v1446_v26, %v2197_v11 }
 0x92c   :  { %v1477_v33 = vadd.f32 %v1448_v34, %v2203_v12  ;;  %v1463_v35 = vrot.slane %v1449_v30, %v2182_v8  ;;  %v1464_v6 = vcombine.high %v1456_v38, %v1456_v38  ;;  %v1478_v37 = vadd.f32 %v1456_v38, %v2208_v13 }
 0x92d   :  { %v1490_v52 = vcombine.low %v1474_v36, %v1475_v31 }
 0x92e   :  { %v1491_v4 = vcombine.low %v1476_v32, %v1477_v33  ;;  %v1465_v48 = vcombine.high %v1463_v35, %v1463_v35  ;;  %v2489_v39 = vadd.f32 %v1464_v6, %v2213_v14  ;;  %v1480_v40 = vadd.f32 %v1463_v35, %v2220_v16  ;;  %v2004_v16 = vld [vmem:[%s2544_s8 + $0x10] sm:$0xff]  }
 0x92f   :  { %v1498_v9 = vrot.slane %v1490_v52, %v2182_v8  ;;  %1964 = vmatpush3.bf16.msra.mxu1 %v2004_v16 }
 0x930   :  { %v2493_v10 = vadd.f32 %v1465_v48, %v2225_v17  ;;  %v1507_v11 = vcombine.low %v1478_v37, %v2489_v39  ;;  %v1505_v12 = vrot.slane %v1491_v4, %v2182_v8  ;;  %1965 = vmatprep.subr.bf16.mxu1 %v2086_v1  ;;  %v2005_v17 = vld [vmem:[%s2544_s8 + $0x8] sm:$0xff]   ;;  %s1747_s8 = sshll.u32 %s2104_s7, 4  ;;  %s1748_s8 = int_to_ptr.vmem [resolvable:$true] %s1747_s8 }
 0x931   :  { %p2064_p6 = scmp.lt.s32.totalorder %s1748_s8, %s1748_s8 }
 0x932   :  { %v1508_v41 = vcombine.low %v1480_v40, %v2493_v10  ;;  %v1515_v42 = vrot.slane %v1507_v11, %v2182_v8  ;;  %v1506_v14 = vcombine.low %v1498_v9, %v1505_v12 }
 0x933   :  { %1966 = vmatpush3.bf16.msra.mxu1 %v2005_v17 }
 0x934   :  { %v1522_v13 = vrot.slane %v1508_v41, %v2182_v8  ;;  %1967 = vmatprep.subr.bf16.mxu1 %v2086_v1  ;;  %v1789_v1 = vld [vmem:[%s2545_s9] ss:$0 sm:$0xff]  ;;  %s2059_s9 = scalar_lea.vmem %s1748_s8, 256 }
 0x935   :  { %p2060_p5 = scmp.ne.s32.totalorder %s1748_s8, %s2059_s9  ;;  %p2065_p7 = scmp.lt.s32.totalorder %s2059_s9, %s2059_s9 }
 0x936   :  { %v1523_v43 = vcombine.low %v1515_v42, %v1522_v13 }
 0x937   :  { %1968 = vmatpush3.bf16.msra.mxu1 %v2006_v46  ;;  %p2066_p8 = por %p2065_p7, %p2064_p6 }
 0x938   :  { %v1526_v44 = vpack.c.bf16 %v1523_v43, %v1506_v14 }
 0x939   :  { %p2067_p9 = pnand %p2066_p8, %p2060_p5 }
 0x93a   :  { %1958 = vmatmul.mubr.msk.bf16.vlgmr.msra.gmra.mxu0 %vm127_vm1, %v1526_v44 }
 0x9fa   :  { %v1587_v47 = vpop.f32.mrf.mxu0 }
 0x9fb   :  { %v1588_v50 = vadd.f32 %v1785_v5, %v1587_v47 }
 0x9fc   :  { %v1959_v49 = vpop.f32.mrf.mxu0 }
 0x9fd   :  { %v1594_v54 = vmax.f32 %v1588_v50, 0.0 }
 0x9fe   :  { %v1590_v51 = vpop.f32.mrf.mxu0 }
 0x9ff   :  { %v1591_v58 = vadd.f32 %v1785_v5, %v1590_v51 }
 0xa00   :  { %v1960_v53 = vpop.f32.mrf.mxu0 }
 0xa01   :  { %v1595_v56 = vmax.f32 %v1591_v58, 0.0 }
 0xa03   :  { %v1596_v57 = vpack.c.bf16 %v1595_v56, %v1594_v54 }
 0xa05   :  { %1970 = vmatmul.mubr.msk.bf16.vlgmr.msra.gmra.mxu1 %vm1636_vm7, %v1596_v57 }
 0xac5   :  { %v1674_v61 = vpop.f32.mrf.mxu1 }
 0xac6   :  { %v1675_v62 = vadd.f32 %v1789_v1, %v1674_v61 }
 0xac7   :  { %v1971_v0 = vpop.f32.mrf.mxu1 }
 0xac8   :  { %v1683_v2 = vcombine.high %v1675_v62, %v1675_v62  ;;  %v1690_v3 = vrot.slane %v1675_v62, %v2182_v8 }
 0xac9   :  { %v1677_v15 = vpop.f32.mrf.mxu1 }
 0xaca   :  { %v1697_v45 = vrot.slane %v1683_v2, %v2182_v8  ;;  %v1698_v18 = vcombine.high %v1690_v3, %v1690_v3  ;;  %v1725_v59 = vadd.f32 %v1690_v3, %v1474_v36  ;;  %v1678_v20 = vadd.f32 %v1789_v1, %v1677_v15 }
 0xacb   :  { %v1972_v21 = vpop.f32.mrf.mxu1 }
 0xacc   :  { %v1699_v22 = vcombine.high %v1697_v45, %v1697_v45  ;;  %v1726_v63 = vadd.f32 %v1698_v18, %v1475_v31  ;;  %v1727_v60 = vadd.f32 %v1697_v45, %v1476_v32  ;;  %1734 = vst.msk [vmem:[#allocation6] sm:$0x3] %vm1733_vm8, %v1725_v59  ;;  %v1700_v55 = vcombine.high %v1678_v20, %v1678_v20 }
 0xacd   :  { %v1707_v23 = vrot.slane %v1678_v20, %v2182_v8 }
 0xace   :  { %v1728_v24 = vadd.f32 %v1699_v22, %v1477_v33  ;;  %1735 = vst.msk [vmem:[#allocation6 + $0x2] sm:$0x3] %vm1733_vm8, %v1726_v63  ;;  %1736 = vst.msk [vmem:[#allocation6 + $0x4] sm:$0x3] %vm1733_vm8, %v1727_v60  ;;  %v1714_v7 = vrot.slane %v1700_v55, %v2182_v8 }
 0xacf   :  { %v1715_v19 = vcombine.high %v1707_v23, %v1707_v23  ;;  %v1729_v25 = vadd.f32 %v1707_v23, %v1478_v37 }
 0xad0   :  { %1737 = vst.msk [vmem:[#allocation6 + $0x6] sm:$0x3] %vm1733_vm8, %v1728_v24  ;;  %v1716_v26 = vcombine.high %v1714_v7, %v1714_v7  ;;  %v1731_v27 = vadd.f32 %v1714_v7, %v1480_v40 }
 0xad1   :  { %v1730_v28 = vadd.f32 %v1715_v19, %v2489_v39  ;;  %1738 = vst.msk [vmem:[#allocation6 + $0x8] sm:$0x3] %vm1733_vm8, %v1729_v25 }
 0xad2   :  { %v1732_v29 = vadd.f32 %v1716_v26, %v2493_v10  ;;  %1740 = vst.msk [vmem:[#allocation6 + $0xc] sm:$0x3] %vm1733_vm8, %v1731_v27 }
 0xad3   :  { %1739 = vst.msk [vmem:[#allocation6 + $0xa] sm:$0x3] %vm1733_vm8, %v1730_v28 }
 0xad4   :  { %1741 = vst.msk [vmem:[#allocation6 + $0xe] sm:$0x3] %vm1733_vm8, %v1732_v29 }
 0xad5   :  { %2070 = shalt.err (!%p2067_p9)
}
 0xad6   :  { %s2105_s16 = smov 32   ;;  %s2106_s23 = smov 2  }
 0xad7   :  { %1753 = dma.vmem_to_hbm [thread:$0]  %s1748_s8, 256, %s2546_s10, [#allocation5], %s2105_s16, %s2105_s16, %s2106_s23  }
 0xad8   :  { %2081 = dma.done.wait [#allocation5], 256  }
 0xad9   :  { %2082 = vsyncadd [#allocation5], 4294967040 }
 0xada   :  { %1757 = vsyncpa [#allocation4], 1 }
 0xadb   :  { %1758 = vsyncpa [#allocation5], 1 }

// kernel: tpu_custom_call.1
= control target key start
LH: loop header
LB: loop body
LE: loop exit
PB: predicated region body
PF: predicated region fallthrough
CT: control target
= control target key end

     0   :  { %15 = vsyncpa [#allocation4], 0  ;;  %s2536_s0 = inlined_call_operand.vmem [shape: f32[8,2,32], index: 0, kind: input, shape index: {}]   ;;  %s2537_s1 = inlined_call_operand.vmem [shape: s8[2,8], index: 1, kind: input, shape index: {}]   ;;  %s2538_s2 = inlined_call_operand.vmem [shape: bf16[32,96], index: 2, kind: input, shape index: {}]   ;;  %s2539_s3 = inlined_call_operand.vmem [shape: f32[1,96], index: 3, kind: input, shape index: {}]   ;;  %s2540_s4 = inlined_call_operand.vmem [shape: bf16[32,32], index: 4, kind: input, shape index: {}]   ;;  %s2541_s5 = inlined_call_operand.vmem [shape: f32[1,32], index: 5, kind: input, shape index: {}]   ;;  %s2542_s6 = inlined_call_operand.hbm [shape: bf16[32,64], index: 6, kind: input, shape index: {}]   ;;  %s2543_s7 = inlined_call_operand.vmem [shape: f32[1,64], index: 7, kind: input, shape index: {}]   ;;  %s2544_s8 = inlined_call_operand.vmem [shape: bf16[64,32], index: 8, kind: input, shape index: {}]   ;;  %s2545_s9 = inlined_call_operand.vmem [shape: f32[1,32], index: 9, kind: input, shape index: {}]   ;;  %s2546_s10 = inlined_call_operand.hbm [shape: f32[8,2,32], index: 10, kind: output, shape index: {}]  }
   0x1   :  { %16 = vsyncpa [#allocation5], 0  ;;  %s2083_s13 = smov [#allocation3]  }
   0x2   :  { %s34_s14 = sshll.u32 %s2083_s13, 4  ;;  %s35_s14 = int_to_ptr.vmem [resolvable:$true] %s34_s14 }
   0x3   :  { %s2047_s15 = scalar_lea.vmem %s35_s14, 256  ;;  %p2052_p1 = scmp.lt.s32.totalorder %s35_s14, %s35_s14 }
   0x4   :  { %p2048_p0 = scmp.ne.s32.totalorder %s35_s14, %s2047_s15  ;;  %p2053_p2 = scmp.lt.s32.totalorder %s2047_s15, %s2047_s15 }
   0x6   :  { %p2054_p3 = por %p2053_p2, %p2052_p1 }
   0x8   :  { %p2055_p4 = pnand %p2054_p3, %p2048_p0 }
   0xa   :  { %2058 = shalt.err (!%p2055_p4)
}
   0xb   :  { %s2084_s16 = smov 64   ;;  %s2085_s17 = smov 4  }
   0xc   :  { %40 = dma.hbm_to_vmem [thread:$0]  %s2542_s6, 256, %s35_s14, [#allocation4], %s2084_s16, %s2084_s16, %s2085_s17  }
   0xd   :  { %2079 = dma.done.wait [#allocation4], 256  }
   0xe   :  { %2080 = vsyncadd [#allocation4], 4294967040  ;;  %v72_v0 = vlaneseq  ;;  %v2086_v1 = vmov 0.0   ;;  %vm2087_vm0 = vmmov 0   ;;  %v2088_v2 = vmov 1983009808  }
   0xf   :  { %1841 = vmatprep.subr.bf16.mxu0 %v2086_v1  ;;  %1845 = vmatprep.mubr.msk.bf16.mxu0 %vm2087_vm0, %v2086_v1  ;;  %v70_v3 = vunpack.c.l.s4 %v2088_v2  ;;  %v1997_v6 = vld [vmem:[%s2538_s2 + $0x8] sm:$0xff]   ;;  %v1998_v7 = vld [vmem:[%s2538_s2] sm:$0xff]   ;;  %vm127_vm1 = vcmask 261120   ;;  %v2089_v30 = vmov 1934713408   ;;  %s2091_s6 = smov 88  }
  0x10   :  { %1849 = vmatprep.subr.bf16.mxu1 %v2086_v1  ;;  %1851 = vmatprep.mubr.msk.bf16.mxu1 %vm2087_vm0, %v2086_v1  ;;  %v2173_v5 = vshrl.u32 %v72_v0, 7  ;;  %v2187_v9 = vld [vmem:[%s2536_s0] sm:$0x3]  ;;  %v2192_v10 = vld [vmem:[%s2536_s0 + $0x2] sm:$0x3]  ;;  %v218_v31 = vunpack.c.l.s4 %v2089_v30  ;;  %s2092_s20 = smov 120  }
  0x11   :  { %v71_v4 = vunpack.c.0.s8 %v70_v3  ;;  %1842 = vmatpush3.bf16.msra.mxu0 %v1997_v6  ;;  %v2197_v11 = vld [vmem:[%s2536_s0 + $0x4] sm:$0x3]  ;;  %v2203_v12 = vld [vmem:[%s2536_s0 + $0x6] sm:$0x3]  ;;  %v2208_v13 = vld [vmem:[%s2536_s0 + $0x8] sm:$0x3]  ;;  %v67_v15 = vcombine.low %v2187_v9, %v2192_v10 }
  0x12   :  { %1843 = vmatprep.subr.bf16.mxu0 %v2086_v1  ;;  %v2213_v14 = vld [vmem:[%s2536_s0 + $0xa] sm:$0x3]  ;;  %v2220_v16 = vld [vmem:[%s2536_s0 + $0xc] sm:$0x3]  ;;  %v2225_v17 = vld [vmem:[%s2536_s0 + $0xe] sm:$0x3]  ;;  %v68_v18 = vcombine.low %v2197_v11, %v2203_v12  ;;  %v219_v36 = vunpack.c.0.s8 %v218_v31 }
  0x13   :  { %v2182_v8 = vsub.s32 %v71_v4, %v2173_v5  ;;  %v84_v19 = vcombine.low %v2208_v13, %v2213_v14  ;;  %v85_v21 = vcombine.low %v2220_v16, %v2225_v17  ;;  %v1759_v28 = vld [vmem:[%s2539_s3] ss:$0 sm:$0xff]  ;;  %s2090_s3 = smov 96   ;;  %vm338_vm2 = vcmask 64512   ;;  %s2096_s23 = smov 112  }
  0x14   :  { %v2248_v45 = vsub.s32 %v219_v36, %v2173_v5  ;;  %vm459_vm3 = vcmask 1043456   ;;  %s2097_s24 = smov 48   ;;  %s2098_s25 = smov 72   ;;  %vm785_vm4 = vcmask 130112   ;;  %vm1016_vm5 = vcmask 195712  }
  0x15   :  { %v75_v20 = vrot.slane %v67_v15, %v2182_v8  ;;  %1844 = vmatpush3.bf16.msra.mxu0 %v1998_v7  ;;  %v82_v22 = vrot.slane %v68_v18, %v2182_v8  ;;  %v92_v23 = vrot.slane %v84_v19, %v2182_v8  ;;  %v99_v24 = vrot.slane %v85_v21, %v2182_v8  ;;  %s2099_s26 = smov 104   ;;  %s2100_s27 = smov 40  }
  0x16   :  { %1855 = vmatprep.subr.bf16.mxu0 %v2086_v1  ;;  %s2101_s28 = smov 8   ;;  %s2102_s2 = smov 16   ;;  %vm1247_vm6 = vcmask 261312   ;;  %vm1636_vm7 = vcmask 523264   ;;  %vm1733_vm8 = vcmask 254976  }
  0x17   :  { %v83_v25 = vcombine.low %v75_v20, %v82_v22  ;;  %v100_v26 = vcombine.low %v92_v23, %v99_v24  ;;  %v252_v22 = vld [vmem:[%s2537_s1] sm:$0x1]  ;;  %v2093_v24 = vmov 1966171168   ;;  %s2094_s1 = smov 56   ;;  %s2103_s13 = smov 24  }
  0x18   :  { %v253_v23 = vunpack.c.0.s8 %v252_v22 }
  0x19   :  { %v103_v27 = vpack.c.bf16 %v100_v26, %v83_v25  ;;  %v258_v25 = vunpack.c.l.s4 %v2093_v24 }
  0x1a   :  { %v254_v26 = vcvt.s32.f32 %v253_v23 }
  0x1b   :  { %1846 = vmatmul.mubr.msk.bf16.vlgmr.msra.gmra.mxu0 %vm127_vm1, %v103_v27  ;;  %v259_v27 = vunpack.c.0.s8 %v258_v25 }
  0x1c   :  { %1857 = vmatprep.mubr.msk.bf16.mxu0 %vm2087_vm0, %v2086_v1 }
  0xdb   :  { %v165_v29 = vpop.f32.mrf.mxu0 }
  0xdc   :  { %v166_v32 = vadd.f32 %v1759_v28, %v165_v29  ;;  %v262_v29 = vsub.s32 %v259_v27, %v2173_v5 }
  0xdd   :  { %v1847_v33 = vpop.f32.mrf.mxu0 }
  0xde   :  { %v174_v34 = vcombine.high %v166_v32, %v166_v32  ;;  %v181_v35 = vrot.slane %v166_v32, %v2182_v8  ;;  %v281_v32 = vsub.s32 0, %v2173_v5 }
  0xdf   :  { %v168_v37 = vpop.f32.mrf.mxu0 }
  0xe0   :  { %v188_v38 = vrot.slane %v174_v34, %v2182_v8  ;;  %v189_v39 = vcombine.high %v181_v35, %v181_v35  ;;  %v169_v40 = vadd.f32 %v1759_v28, %v168_v37  ;;  %v255_v28 = vmul.f32 -1e+30, %v254_v26 }
  0xe1   :  { %v1848_v41 = vpop.f32.mrf.mxu0 }
  0xe2   :  { %v190_v42 = vcombine.high %v188_v38, %v188_v38  ;;  %v191_v43 = vcombine.high %v169_v40, %v169_v40  ;;  %v198_v44 = vrot.slane %v169_v40, %v2182_v8  ;;  %v216_v46 = vcombine.low %v181_v35, %v189_v39 }
  0xe3   :  { %v263_v30 = vrot.slane %v255_v28, %v262_v29 }
  0xe4   :  { %v225_v47 = vcombine.low %v188_v38, %v190_v42  ;;  %v205_v48 = vrot.slane %v191_v43, %v2182_v8  ;;  %v206_v49 = vcombine.high %v198_v44, %v198_v44  ;;  %v223_v53 = vrot.slane %v216_v46, %v2248_v45 }
  0xe5   :  { %v271_v31 = vrot.slane %v263_v30, %v262_v29  ;;  %v264_v33 = vcombine.high %v263_v30, %v263_v30 }
  0xe6   :  { %v232_v50 = vrot.slane %v225_v47, %v2248_v45  ;;  %v207_v51 = vcombine.high %v205_v48, %v205_v48  ;;  %v234_v52 = vcombine.low %v198_v44, %v206_v49 }
  0xe7   :  { %v2290_v34 = vrot.slane %v271_v31, %v281_v32  ;;  %v278_v35 = vrot.slane %v264_v33, %v262_v29 }
  0xe8   :  { %v243_v54 = vcombine.low %v205_v48, %v207_v51  ;;  %v297_v55 = vcombine.low %v223_v53, %v232_v50  ;;  %v241_v56 = vrot.slane %v234_v52, %v2248_v45  ;;  %v1763_v58 = vcombine.high %v223_v53, %v232_v50 }
  0xe9   :  { %v2293_v38 = vrot.slane %v278_v35, %v281_v32 }
  0xea   :  { %v250_v57 = vrot.slane %v243_v54, %v2248_v45  ;;  %v305_v61 = vrot.slane %v297_v55, %v2182_v8  ;;  %v322_v0 = vrot.slane %v1763_v58, %v2182_v8 }
  0xec   :  { %v298_v59 = vcombine.low %v241_v56, %v250_v57  ;;  %v1764_v60 = vcombine.high %v241_v56, %v250_v57 }
  0xee   :  { %v312_v62 = vrot.slane %v298_v59, %v2182_v8  ;;  %v329_v63 = vrot.slane %v1764_v60, %v2182_v8 }
  0xf0   :  { %v313_v2 = vcombine.low %v305_v61, %v312_v62  ;;  %v330_v3 = vcombine.low %v322_v0, %v329_v63 }
  0xf2   :  { %v2259_v4 = vpack.c.bf16 %v313_v2, %v313_v2  ;;  %v2262_v6 = vpack.c.bf16 %v330_v3, %v330_v3 }
  0xf4   :  { %336 = vrot.lane.b32.xlu0 %v2259_v4, %s2090_s3 }
  0xf8   :  { %386 = vrot.lane.b32.xlu0 %v2262_v6, %s2090_s3 }
  0xfc   :  { %454 = vrot.lane.b32.xlu0 %v2259_v4, %s2084_s16 }
 0x100   :  { %559 = vrot.lane.b32.xlu0 %v2259_v4, %s2091_s6 }
 0x104   :  { %609 = vrot.lane.b32.xlu0 %v2262_v6, %s2091_s6 }
 0x108   :  { %557 = vrot.lane.b32.xlu0 %v2259_v4, %s2092_s20 }
 0x10c   :  { %607 = vrot.lane.b32.xlu0 %v2262_v6, %s2092_s20 }
 0x166   :  { %v337_v7 = vpop.permute.xlu0 %336 }
 0x167   :  { %v343_v15 = vsel %vm338_vm2, %v337_v7, 0 }
 0x168   :  { %1850 = vmatpush3.bf16.xpose.msra.mxu1 %v343_v15 }
 0x169   :  { %1861 = vmatprep.subr.bf16.mxu1 %v2086_v1 }
 0x16a   :  { %v387_v18 = vpop.permute.xlu0 %386 }
 0x16b   :  { %v392_v19 = vsel %vm338_vm2, %v387_v18, 0 }
 0x16c   :  { %1856 = vmatpush3.bf16.xpose.msra.mxu0 %v392_v19 }
 0x16d   :  { %1867 = vmatprep.subr.bf16.mxu0 %v2086_v1 }
 0x16e   :  { %v455_v20 = vpop.permute.xlu0 %454 }
 0x16f   :  { %v461_v21 = vsel %vm459_vm3, %v455_v20, 0  ;;  %1852 = vmatmul.mubr.msk.bf16.vlgmr.msra.gmra.mxu1 %vm338_vm2, %v2259_v4 }
 0x170   :  { %1862 = vmatpush3.bf16.msra.mxu1 %v461_v21  ;;  %1863 = vmatprep.mubr.msk.bf16.mxu1 %vm2087_vm0, %v2086_v1 }
 0x171   :  { %1873 = vmatprep.subr.bf16.mxu1 %v2086_v1 }
 0x172   :  { %v560_v57 = vpop.permute.xlu0 %559 }
 0x173   :  { %1858 = vmatmul.mubr.msk.bf16.vlgmr.msra.gmra.mxu0 %vm338_vm2, %v2262_v6  ;;  %v565_v61 = vsel %vm338_vm2, %v560_v57, 0 }
 0x174   :  { %1869 = vmatprep.mubr.msk.bf16.mxu0 %vm2087_vm0, %v2086_v1 }
 0x176   :  { %v610_v60 = vpop.permute.xlu0 %609 }
 0x177   :  { %v615_v0 = vsel %vm338_vm2, %v610_v60, 0 }
 0x17a   :  { %v558_v2 = vpop.permute.xlu0 %557 }
 0x17e   :  { %v608_v3 = vpop.permute.xlu0 %607 }
 0x22f   :  { %v379_v36 = vpop.f32.mrf.mxu1 }
 0x230   :  { %v380_v37 = vadd.f32 %v379_v36, %v2290_v34 }
 0x231   :  { %v1853_v39 = vpop.f32.mrf.mxu1 }
 0x232   :  { %v434_v40 = vsel %vm338_vm2, %v380_v37, -inf }
 0x233   :  { %435 = vmax.xlane.f32.xlu1 %v434_v40  ;;  %v382_v41 = vpop.f32.mrf.mxu1  ;;  %v428_v42 = vpop.f32.mrf.mxu0 }
 0x234   :  { %v429_v43 = vadd.f32 %v428_v42, %v2293_v38 }
 0x235   :  { %v1854_v44 = vpop.f32.mrf.mxu1  ;;  %v1859_v46 = vpop.f32.mrf.mxu0 }
 0x236   :  { %v437_v5 = vsel %vm338_vm2, %v429_v43, -inf }
 0x237   :  { %438 = vmax.xlane.f32.xlu1 %v437_v5  ;;  %v431_v47 = vpop.f32.mrf.mxu0 }
 0x239   :  { %v1860_v48 = vpop.f32.mrf.mxu0 }
 0x248   :  { %503 = vrot.lane.b32.xlu1 %v2262_v6, %s2084_s16  ;;  %s2095_s16 = smov 80  }
 0x2bc   :  { %v436_v49 = vpop.xlane.xlu1 %435 }
 0x2bd   :  { %v440_v50 = vsub.f32 %v380_v37, %v436_v49 }
 0x2bf   :  { %v442_v51 = vmul.f32 1.442695, %v440_v50 }
 0x2c0   :  { %v439_v52 = vpop.xlane.xlu1 %438 }
 0x2c1   :  { %2007 = vpow2.f32 %v442_v51  ;;  %v441_v53 = vsub.f32 %v429_v43, %v439_v52 }
 0x2c3   :  { %v444_v54 = vmul.f32 1.442695, %v441_v53 }
 0x2c4   :  { %v504_v55 = vpop.permute.xlu1 %503 }
 0x2c5   :  { %2009 = vpow2.f32 %v444_v54  ;;  %v509_v56 = vsel %vm459_vm3, %v504_v55, 0 }
 0x2c6   :  { %1868 = vmatpush3.bf16.msra.mxu0 %v509_v56 }
 0x2c7   :  { %1879 = vmatprep.subr.bf16.mxu0 %v2086_v1 }
 0x2ce   :  { %v2302_v58 = vpop.eup %2007 }
 0x2cf   :  { %v452_v59 = vpack.c.bf16 %v2302_v58, %v2302_v58 }
 0x2d1   :  { %1864 = vmatmul.mubr.msk.bf16.vlgmr.msra.gmra.mxu1 %vm338_vm2, %v452_v59 }
 0x2d2   :  { %v2308_v62 = vpop.eup %2009  ;;  %1874 = vmatpush3.bf16.xpose.msra.mxu1 %v565_v61  ;;  %1875 = vmatprep.mubr.msk.bf16.mxu1 %vm2087_vm0, %v2086_v1 }
 0x2d3   :  { %v453_v63 = vpack.c.bf16 %v2308_v62, %v2308_v62  ;;  %1885 = vmatprep.subr.bf16.mxu1 %v2086_v1 }
 0x2d5   :  { %1870 = vmatmul.mubr.msk.bf16.vlgmr.msra.gmra.mxu0 %vm338_vm2, %v453_v63 }
 0x2d6   :  { %1880 = vmatpush3.bf16.xpose.msra.mxu0 %v615_v0  ;;  %1881 = vmatprep.mubr.msk.bf16.mxu0 %vm2087_vm0, %v2086_v1 }
 0x2d7   :  { %1891 = vmatprep.subr.bf16.mxu0 %v2086_v1 }
 0x2d9   :  { %1876 = vmatmul.mubr.msk.bf16.vlgmr.msra.gmra.mxu1 %vm338_vm2, %v558_v2 }
 0x2da   :  { %1887 = vmatprep.mubr.msk.bf16.mxu1 %vm2087_vm0, %v2086_v1 }
 0x2dd   :  { %1882 = vmatmul.mubr.msk.bf16.vlgmr.msra.gmra.mxu0 %vm338_vm2, %v608_v3 }
 0x2de   :  { %1893 = vmatprep.mubr.msk.bf16.mxu0 %vm2087_vm0, %v2086_v1 }
 0x391   :  { %v2326_v7 = vpop.f32.mrf.mxu1 }
 0x393   :  { %v1865_v15 = vpop.f32.mrf.mxu1 }
 0x395   :  { %v500_v18 = vpop.f32.mrf.mxu1  ;;  %v2328_v19 = vpop.f32.mrf.mxu0 }
 0x397   :  { %v1866_v20 = vpop.f32.mrf.mxu1  ;;  %v1871_v21 = vpop.f32.mrf.mxu0 }
 0x399   :  { %v548_v22 = vpop.f32.mrf.mxu0  ;;  %v601_v23 = vpop.f32.mrf.mxu1 }
 0x39a   :  { %v602_v24 = vadd.f32 %v601_v23, %v2290_v34 }
 0x39b   :  { %v1872_v25 = vpop.f32.mrf.mxu0  ;;  %v1877_v26 = vpop.f32.mrf.mxu1 }
 0x39c   :  { %v657_v27 = vsel %vm338_vm2, %v602_v24, -inf }
 0x39d   :  { %v604_v28 = vpop.f32.mrf.mxu1  ;;  %658 = vmax.xlane.f32.xlu1 %v657_v27  ;;  %v651_v29 = vpop.f32.mrf.mxu0 }
 0x39e   :  { %v652_v30 = vadd.f32 %v651_v29, %v2293_v38 }
 0x39f   :  { %v1878_v31 = vpop.f32.mrf.mxu1  ;;  %v1883_v32 = vpop.f32.mrf.mxu0 }
 0x3a0   :  { %v660_v33 = vsel %vm338_vm2, %v652_v30, -inf }
 0x3a1   :  { %661 = vmax.xlane.f32.xlu0 %v660_v33  ;;  %v654_v35 = vpop.f32.mrf.mxu0 }
 0x3a3   :  { %v1884_v36 = vpop.f32.mrf.mxu0 }
 0x3ae   :  { %725 = vrot.lane.b32.xlu1 %v2262_v6, %s2094_s1 }
 0x3b2   :  { %790 = vrot.lane.b32.xlu1 %v2259_v4, %s2095_s16 }
 0x3b6   :  { %788 = vrot.lane.b32.xlu1 %v2259_v4, %s2096_s23 }
 0x3b7   :  { %677 = vrot.lane.b32.xlu0 %v2259_v4, %s2094_s1 }
 0x3bb   :  { %840 = vrot.lane.b32.xlu0 %v2262_v6, %s2095_s16 }
 0x3bf   :  { %838 = vrot.lane.b32.xlu0 %v2262_v6, %s2096_s23 }
 0x426   :  { %v659_v37 = vpop.xlane.xlu1 %658 }
 0x427   :  { %v663_v39 = vsub.f32 %v602_v24, %v659_v37 }
 0x429   :  { %v665_v40 = vmul.f32 1.442695, %v663_v39 }
 0x42a   :  { %v726_v41 = vpop.permute.xlu1 %725  ;;  %v662_v42 = vpop.xlane.xlu0 %661 }
 0x42b   :  { %2011 = vpow2.f32 %v665_v40  ;;  %v731_v43 = vsel %vm459_vm3, %v726_v41, 0  ;;  %v664_v44 = vsub.f32 %v652_v30, %v662_v42 }
 0x42c   :  { %1892 = vmatpush3.bf16.msra.mxu0 %v731_v43 }
 0x42d   :  { %v667_v46 = vmul.f32 1.442695, %v664_v44  ;;  %1903 = vmatprep.subr.bf16.mxu0 %v2086_v1 }
 0x42e   :  { %v678_v5 = vpop.permute.xlu0 %677  ;;  %v791_v49 = vpop.permute.xlu1 %790 }
 0x42f   :  { %2013 = vpow2.f32 %v667_v46  ;;  %v683_v47 = vsel %vm459_vm3, %v678_v5, 0  ;;  %v796_v51 = vsel %vm338_vm2, %v791_v49, 0 }
 0x430   :  { %1886 = vmatpush3.bf16.msra.mxu1 %v683_v47 }
 0x431   :  { %1897 = vmatprep.subr.bf16.mxu1 %v2086_v1 }
 0x432   :  { %v841_v53 = vpop.permute.xlu0 %840  ;;  %v789_v56 = vpop.permute.xlu1 %788 }
 0x433   :  { %v846_v55 = vsel %vm338_vm2, %v841_v53, 0 }
 0x436   :  { %v839_v57 = vpop.permute.xlu0 %838 }
 0x438   :  { %v2344_v48 = vpop.eup %2011 }
 0x439   :  { %v675_v50 = vpack.c.bf16 %v2344_v48, %v2344_v48 }
 0x43b   :  { %1888 = vmatmul.mubr.msk.bf16.vlgmr.msra.gmra.mxu1 %vm338_vm2, %v675_v50 }
 0x43c   :  { %v2350_v52 = vpop.eup %2013  ;;  %1898 = vmatpush3.bf16.xpose.msra.mxu1 %v796_v51  ;;  %1899 = vmatprep.mubr.msk.bf16.mxu1 %vm2087_vm0, %v2086_v1 }
 0x43d   :  { %v676_v54 = vpack.c.bf16 %v2350_v52, %v2350_v52  ;;  %1909 = vmatprep.subr.bf16.mxu1 %v2086_v1 }
 0x43f   :  { %1894 = vmatmul.mubr.msk.bf16.vlgmr.msra.gmra.mxu0 %vm338_vm2, %v676_v54 }
 0x440   :  { %1904 = vmatpush3.bf16.xpose.msra.mxu0 %v846_v55  ;;  %1905 = vmatprep.mubr.msk.bf16.mxu0 %vm2087_vm0, %v2086_v1 }
 0x441   :  { %1915 = vmatprep.subr.bf16.mxu0 %v2086_v1 }
 0x443   :  { %1900 = vmatmul.mubr.msk.bf16.vlgmr.msra.gmra.mxu1 %vm338_vm2, %v789_v56 }
 0x444   :  { %1911 = vmatprep.mubr.msk.bf16.mxu1 %vm2087_vm0, %v2086_v1 }
 0x447   :  { %1906 = vmatmul.mubr.msk.bf16.vlgmr.msra.gmra.mxu0 %vm338_vm2, %v839_v57 }
 0x448   :  { %1917 = vmatprep.mubr.msk.bf16.mxu0 %vm2087_vm0, %v2086_v1 }
 0x4fb   :  { %v2368_v59 = vpop.f32.mrf.mxu1 }
 0x4fd   :  { %v1889_v60 = vpop.f32.mrf.mxu1 }
 0x4ff   :  { %v722_v61 = vpop.f32.mrf.mxu1  ;;  %v2370_v63 = vpop.f32.mrf.mxu0 }
 0x501   :  { %v1890_v0 = vpop.f32.mrf.mxu1  ;;  %v1895_v2 = vpop.f32.mrf.mxu0 }
 0x503   :  { %v770_v3 = vpop.f32.mrf.mxu0  ;;  %v832_v15 = vpop.f32.mrf.mxu1 }
 0x504   :  { %v833_v18 = vadd.f32 %v832_v15, %v2290_v34 }
 0x505   :  { %v1896_v20 = vpop.f32.mrf.mxu0  ;;  %v1901_v21 = vpop.f32.mrf.mxu1 }
 0x506   :  { %v888_v22 = vsel %vm338_vm2, %v833_v18, -inf }
 0x507   :  { %889 = vmax.xlane.f32.xlu1 %v888_v22  ;;  %v835_v23 = vpop.f32.mrf.mxu1  ;;  %v882_v24 = vpop.f32.mrf.mxu0 }
 0x508   :  { %v883_v25 = vadd.f32 %v882_v24, %v2293_v38 }
 0x509   :  { %v1902_v26 = vpop.f32.mrf.mxu1  ;;  %v1907_v27 = vpop.f32.mrf.mxu0 }
 0x50a   :  { %v891_v28 = vsel %vm338_vm2, %v883_v25, -inf }
 0x50b   :  { %892 = vmax.xlane.f32.xlu0 %v891_v28  ;;  %v885_v29 = vpop.f32.mrf.mxu0 }
 0x50d   :  { %v1908_v30 = vpop.f32.mrf.mxu0 }
 0x518   :  { %956 = vrot.lane.b32.xlu1 %v2262_v6, %s2097_s24 }
 0x51c   :  { %1021 = vrot.lane.b32.xlu1 %v2259_v4, %s2098_s25 }
 0x520   :  { %1019 = vrot.lane.b32.xlu1 %v2259_v4, %s2099_s26 }
 0x521   :  { %908 = vrot.lane.b32.xlu0 %v2259_v4, %s2097_s24 }
 0x525   :  { %1071 = vrot.lane.b32.xlu0 %v2262_v6, %s2098_s25 }
 0x529   :  { %1069 = vrot.lane.b32.xlu0 %v2262_v6, %s2099_s26 }
 0x590   :  { %v890_v31 = vpop.xlane.xlu1 %889 }
 0x591   :  { %v894_v32 = vsub.f32 %v833_v18, %v890_v31 }
 0x593   :  { %v896_v33 = vmul.f32 1.442695, %v894_v32 }
 0x594   :  { %v957_v35 = vpop.permute.xlu1 %956  ;;  %v893_v36 = vpop.xlane.xlu0 %892 }
 0x595   :  { %2015 = vpow2.f32 %v896_v33  ;;  %v962_v37 = vsel %vm459_vm3, %v957_v35, 0  ;;  %v895_v39 = vsub.f32 %v883_v25, %v893_v36 }
 0x596   :  { %1916 = vmatpush3.bf16.msra.mxu0 %v962_v37 }
 0x597   :  { %v898_v40 = vmul.f32 1.442695, %v895_v39  ;;  %1927 = vmatprep.subr.bf16.mxu0 %v2086_v1 }
 0x598   :  { %v909_v41 = vpop.permute.xlu0 %908  ;;  %v1022_v44 = vpop.permute.xlu1 %1021 }
 0x599   :  { %2017 = vpow2.f32 %v898_v40  ;;  %v914_v42 = vsel %vm459_vm3, %v909_v41, 0  ;;  %v1027_v5 = vsel %vm338_vm2, %v1022_v44, 0  ;;  %v446_v44 = vsel %vm338_vm2, %v2302_v58, 0.0 }
 0x59a   :  { %1910 = vmatpush3.bf16.msra.mxu1 %v914_v42 }
 0x59b   :  { %1921 = vmatprep.subr.bf16.mxu1 %v2086_v1 }
 0x59c   :  { %v1072_v49 = vpop.permute.xlu0 %1071  ;;  %v1020_v53 = vpop.permute.xlu1 %1019 }
 0x59d   :  { %v1077_v51 = vsel %vm338_vm2, %v1072_v49, 0 }
 0x5a0   :  { %v1070_v54 = vpop.permute.xlu0 %1069 }
 0x5a2   :  { %v2016_v43 = vpop.eup %2015 }
 0x5a3   :  { %v906_v46 = vpack.c.bf16 %v2016_v43, %v2016_v43  ;;  %v900_v31 = vsel %vm338_vm2, %v2016_v43, 0.0 }
 0x5a5   :  { %1912 = vmatmul.mubr.msk.bf16.vlgmr.msra.gmra.mxu1 %vm338_vm2, %v906_v46 }
 0x5a6   :  { %v2018_v47 = vpop.eup %2017  ;;  %1922 = vmatpush3.bf16.xpose.msra.mxu1 %v1027_v5  ;;  %1923 = vmatprep.mubr.msk.bf16.mxu1 %vm2087_vm0, %v2086_v1 }
 0x5a7   :  { %v907_v50 = vpack.c.bf16 %v2018_v47, %v2018_v47  ;;  %1933 = vmatprep.subr.bf16.mxu1 %v2086_v1  ;;  %v903_v30 = vsel %vm338_vm2, %v2018_v47, 0.0  ;;  %v449_v47 = vsel %vm338_vm2, %v2308_v62, 0.0 }
 0x5a9   :  { %1918 = vmatmul.mubr.msk.bf16.vlgmr.msra.gmra.mxu0 %vm338_vm2, %v907_v50 }
 0x5aa   :  { %1928 = vmatpush3.bf16.xpose.msra.mxu0 %v1077_v51  ;;  %1929 = vmatprep.mubr.msk.bf16.mxu0 %vm2087_vm0, %v2086_v1 }
 0x5ab   :  { %1939 = vmatprep.subr.bf16.mxu0 %v2086_v1 }
 0x5ad   :  { %1924 = vmatmul.mubr.msk.bf16.vlgmr.msra.gmra.mxu1 %vm338_vm2, %v1020_v53 }
 0x5ae   :  { %1935 = vmatprep.mubr.msk.bf16.mxu1 %vm2087_vm0, %v2086_v1 }
 0x5b1   :  { %1930 = vmatmul.mubr.msk.bf16.vlgmr.msra.gmra.mxu0 %vm338_vm2, %v1070_v54 }
 0x5b2   :  { %1941 = vmatprep.mubr.msk.bf16.mxu0 %vm2087_vm0, %v2086_v1 }
 0x665   :  { %v2402_v55 = vpop.f32.mrf.mxu1 }
 0x667   :  { %v1913_v56 = vpop.f32.mrf.mxu1 }
 0x669   :  { %v953_v57 = vpop.f32.mrf.mxu1  ;;  %v2404_v60 = vpop.f32.mrf.mxu0 }
 0x66b   :  { %v1914_v61 = vpop.f32.mrf.mxu1  ;;  %v1919_v0 = vpop.f32.mrf.mxu0 }
 0x66d   :  { %v1001_v2 = vpop.f32.mrf.mxu0  ;;  %v1063_v3 = vpop.f32.mrf.mxu1 }
 0x66e   :  { %v1064_v15 = vadd.f32 %v1063_v3, %v2290_v34  ;;  %v669_v34 = vsel %vm338_vm2, %v2344_v48, 0.0 }
 0x66f   :  { %v1920_v18 = vpop.f32.mrf.mxu0  ;;  %v1925_v20 = vpop.f32.mrf.mxu1 }
 0x670   :  { %v1119_v21 = vsel %vm338_vm2, %v1064_v15, -inf }
 0x671   :  { %1120 = vmax.xlane.f32.xlu1 %v1119_v21  ;;  %v1066_v22 = vpop.f32.mrf.mxu1  ;;  %v1113_v23 = vpop.f32.mrf.mxu0 }
 0x672   :  { %v1114_v24 = vadd.f32 %v1113_v23, %v2293_v38  ;;  %v672_v38 = vsel %vm338_vm2, %v2350_v52, 0.0 }
 0x673   :  { %v1926_v25 = vpop.f32.mrf.mxu1  ;;  %v1931_v26 = vpop.f32.mrf.mxu0 }
 0x674   :  { %v1122_v27 = vsel %vm338_vm2, %v1114_v24, -inf }
 0x675   :  { %1123 = vmax.xlane.f32.xlu0 %v1122_v27  ;;  %v1116_v28 = vpop.f32.mrf.mxu0 }
 0x677   :  { %v1932_v29 = vpop.f32.mrf.mxu0 }
 0x682   :  { %1187 = vrot.lane.b32.xlu1 %v2262_v6, %s2100_s27 }
 0x68b   :  { %1139 = vrot.lane.b32.xlu0 %v2259_v4, %s2100_s27 }
 0x6a6   :  { %670 = vadd.xlane.f32.xlu1 %v669_v34 }
 0x6aa   :  { %904 = vadd.xlane.f32.xlu1 %v903_v30  ;;  %673 = vadd.xlane.f32.xlu0 %v672_v38 }
 0x6ae   :  { %901 = vadd.xlane.f32.xlu0 %v900_v31 }
 0x6fa   :  { %v1121_v32 = vpop.xlane.xlu1 %1120 }
 0x6fb   :  { %v1125_v33 = vsub.f32 %v1064_v15, %v1121_v32 }
 0x6fd   :  { %v1127_v35 = vmul.f32 1.442695, %v1125_v33 }
 0x6fe   :  { %v1188_v6 = vpop.permute.xlu1 %1187  ;;  %v1124_v36 = vpop.xlane.xlu0 %1123 }
 0x6ff   :  { %2019 = vpow2.f32 %v1127_v35  ;;  %v1193_v4 = vsel %vm459_vm3, %v1188_v6, 0  ;;  %v1126_v48 = vsub.f32 %v1114_v24, %v1124_v36 }
 0x700   :  { %1940 = vmatpush3.bf16.msra.mxu0 %v1193_v4 }
 0x701   :  { %v1129_v37 = vmul.f32 1.442695, %v1126_v48  ;;  %1953 = vmatprep.subr.bf16.mxu0 %v2086_v1 }
 0x702   :  { %v1140_v39 = vpop.permute.xlu0 %1139 }
 0x703   :  { %2021 = vpow2.f32 %v1129_v37  ;;  %v1145_v52 = vsel %vm459_vm3, %v1140_v39, 0 }
 0x704   :  { %1934 = vmatpush3.bf16.msra.mxu1 %v1145_v52 }
 0x705   :  { %1945 = vmatprep.subr.bf16.mxu1 %v2086_v1 }
 0x70c   :  { %v2020_v40 = vpop.eup %2019 }
 0x70d   :  { %v1131_v41 = vsel %vm338_vm2, %v2020_v40, 0.0  ;;  %v1137_v42 = vpack.c.bf16 %v2020_v40, %v2020_v40 }
 0x70e   :  { %1132 = vadd.xlane.f32.xlu0 %v1131_v41 }
 0x70f   :  { %1936 = vmatmul.mubr.msk.bf16.vlgmr.msra.gmra.mxu1 %vm338_vm2, %v1137_v42 }
 0x710   :  { %v2022_v43 = vpop.eup %2021  ;;  %1949 = vmatprep.mubr.msk.bf16.mxu1 %vm2087_vm0, %v2086_v1 }
 0x711   :  { %v1134_v46 = vsel %vm338_vm2, %v2022_v43, 0.0  ;;  %v1138_v5 = vpack.c.bf16 %v2022_v43, %v2022_v43 }
 0x712   :  { %447 = vadd.xlane.f32.xlu0 %v446_v44  ;;  %1135 = vadd.xlane.f32.xlu1 %v1134_v46 }
 0x713   :  { %1942 = vmatmul.mubr.msk.bf16.vlgmr.msra.gmra.mxu0 %vm338_vm2, %v1138_v5 }
 0x714   :  { %1957 = vmatprep.mubr.msk.bf16.mxu0 %vm2087_vm0, %v2086_v1 }
 0x716   :  { %450 = vadd.xlane.f32.xlu1 %v449_v47 }
 0x72f   :  { %v671_v49 = vpop.xlane.xlu1 %670 }
 0x730   :  { %2023 = vrcp.f32 %v671_v49 }
 0x733   :  { %v905_v50 = vpop.xlane.xlu1 %904  ;;  %v674_v51 = vpop.xlane.xlu0 %673 }
 0x734   :  { %2025 = vrcp.f32 %v905_v50 }
 0x735   :  { %2027 = vrcp.f32 %v674_v51 }
 0x737   :  { %v902_v58 = vpop.xlane.xlu0 %901 }
 0x738   :  { %2029 = vrcp.f32 %v902_v58 }
 0x73d   :  { %v2024_v53 = vpop.eup %2023 }
 0x73e   :  { %v775_v54 = vmul.f32 %v2024_v53, %v2368_v59 }
 0x740   :  { %779 = vrot.lane.b32.xlu0 %v775_v54, %s2101_s28 }
 0x741   :  { %v2026_v56 = vpop.eup %2025 }
 0x742   :  { %v2028_v57 = vpop.eup %2027  ;;  %v1007_v61 = vmul.f32 %v2026_v56, %v2404_v60 }
 0x743   :  { %v776_v62 = vmul.f32 %v2028_v57, %v2370_v63 }
 0x744   :  { %1012 = vrot.lane.b32.xlu0 %v1007_v61, %s2102_s2 }
 0x745   :  { %v2030_v0 = vpop.eup %2029  ;;  %781 = vrot.lane.b32.xlu1 %v776_v62, %s2101_s28 }
 0x746   :  { %v1006_v2 = vmul.f32 %v2030_v0, %v2402_v55 }
 0x749   :  { %1010 = vrot.lane.b32.xlu1 %v1006_v2, %s2102_s2 }
 0x797   :  { %v1133_v3 = vpop.xlane.xlu0 %1132 }
 0x79b   :  { %v1136_v15 = vpop.xlane.xlu1 %1135  ;;  %v448_v18 = vpop.xlane.xlu0 %447 }
 0x79c   :  { %2031 = vrcp.f32 %v448_v18 }
 0x79f   :  { %v451_v59 = vpop.xlane.xlu1 %450 }
 0x7a0   :  { %2033 = vrcp.f32 %v451_v59 }
 0x7a1   :  { %2035 = vrcp.f32 %v1133_v3 }
 0x7a2   :  { %2037 = vrcp.f32 %v1136_v15 }
 0x7a9   :  { %v2032_v20 = vpop.eup %2031 }
 0x7aa   :  { %v553_v21 = vmul.f32 %v2032_v20, %v2326_v7  ;;  %v1999_v7 = vld [vmem:[%s2540_s4 + $0x8] sm:$0xff]  }
 0x7ab   :  { %1946 = vmatpush3.bf16.msra.mxu1 %v1999_v7 }
 0x7ac   :  { %555 = vst.msk [vmem:[#allocation2] sm:$0xff] %vm338_vm2, %v553_v21  ;;  %1947 = vmatprep.subr.bf16.mxu1 %v2086_v1  ;;  %v2001_v21 = vld [vmem:[#allocation3 + $0x8] sm:$0xff]  }
 0x7ad   :  { %v2034_v22 = vpop.eup %2033  ;;  %1954 = vmatpush3.bf16.msra.mxu0 %v2001_v21 }
 0x7ae   :  { %v554_v63 = vmul.f32 %v2034_v22, %v2328_v19  ;;  %v2000_v19 = vld [vmem:[%s2540_s4] sm:$0xff]   ;;  %v2036_v25 = vpop.eup %2035  ;;  %1955 = vmatprep.subr.bf16.mxu0 %v2086_v1  ;;  %v2002_v22 = vld [vmem:[#allocation3] sm:$0xff]  }
 0x7af   :  { %1948 = vmatpush3.bf16.msra.mxu1 %v2000_v19  ;;  %v2038_v29 = vpop.eup %2037 }
 0x7b0   :  { %556 = vst.msk [vmem:[#allocation2 + $0x8] sm:$0xff] %vm338_vm2, %v554_v63  ;;  %1961 = vmatprep.subr.bf16.mxu1 %v2086_v1  ;;  %v2003_v63 = vld [vmem:[%s2544_s8 + $0x18] sm:$0xff]  }
 0x7b1   :  { %1956 = vmatpush3.bf16.msra.mxu0 %v2002_v22 }
 0x7b2   :  { %v780_v60 = vpop.permute.xlu0 %779 }
 0x7b3   :  { %786 = vst.msk [vmem:[#allocation2] sm:$0xff] %vm785_vm4, %v780_v60  ;;  %v1781_v60 = vld [vmem:[%s2541_s5] ss:$0 sm:$0xff] }
 0x7b6   :  { %v1013_v55 = vpop.permute.xlu0 %1012 }
 0x7b7   :  { %v782_v23 = vpop.permute.xlu1 %781 }
 0x7b8   :  { %787 = vst.msk [vmem:[#allocation2 + $0x8] sm:$0xff] %vm785_vm4, %v782_v23 }
 0x7b9   :  { %1018 = vst.msk [vmem:[#allocation2 + $0x8] sm:$0xff] %vm1016_vm5, %v1013_v55 }
 0x7bb   :  { %v1011_v24 = vpop.permute.xlu1 %1010 }
 0x7bc   :  { %1017 = vst.msk [vmem:[#allocation2] sm:$0xff] %vm1016_vm5, %v1011_v24 }
 0x7cf   :  { %v1181_v26 = vpop.f32.mrf.mxu1 }
 0x7d0   :  { %v1237_v27 = vmul.f32 %v2036_v25, %v1181_v26 }
 0x7d1   :  { %v1937_v28 = vpop.f32.mrf.mxu1 }
 0x7d2   :  { %1241 = vrot.lane.b32.xlu1 %v1237_v27, %s2103_s13 }
 0x7d3   :  { %v1184_v34 = vpop.f32.mrf.mxu1  ;;  %v1229_v30 = vpop.f32.mrf.mxu0 }
 0x7d4   :  { %v1238_v38 = vmul.f32 %v2038_v29, %v1229_v30 }
 0x7d5   :  { %v1938_v31 = vpop.f32.mrf.mxu1  ;;  %v1943_v32 = vpop.f32.mrf.mxu0 }
 0x7d6   :  { %1243 = vrot.lane.b32.xlu0 %v1238_v38, %s2103_s13 }
 0x7d7   :  { %v1232_v33 = vpop.f32.mrf.mxu0 }
 0x7d9   :  { %v1944_v35 = vpop.f32.mrf.mxu0 }
 0x844   :  { %v1242_v6 = vpop.permute.xlu1 %1241 }
 0x845   :  { %1248 = vst.msk [vmem:[#allocation2] sm:$0xff] %vm1247_vm6, %v1242_v6 }
 0x848   :  { %v1244_v36 = vpop.permute.xlu0 %1243 }
 0x849   :  { %1249 = vst.msk [vmem:[#allocation2 + $0x8] sm:$0xff] %vm1247_vm6, %v1244_v36 }
 0x84c   :  { %v1250_v4 = vld [vmem:[#allocation2] sm:$0xff] }
 0x84d   :  { %v1252_v48 = vcombine.high %v1250_v4, %v2086_v1  ;;  %v1259_v39 = vrot.slane %v1250_v4, %v2182_v8 }
 0x84f   :  { %v1266_v41 = vrot.slane %v1252_v48, %v2182_v8 }
 0x850   :  { %v1251_v37 = vld [vmem:[#allocation2 + $0x8] sm:$0xff] }
 0x851   :  { %v1267_v52 = vcombine.high %v1251_v37, %v2086_v1  ;;  %v1274_v40 = vrot.slane %v1251_v37, %v2182_v8 }
 0x853   :  { %v1281_v42 = vrot.slane %v1267_v52, %v2182_v8  ;;  %v1282_v43 = vcombine.low %v1259_v39, %v1274_v40  ;;  %v1283_v44 = vcombine.high %v1259_v39, %v1274_v40 }
 0x855   :  { %v1290_v46 = vrot.slane %v1282_v43, %v2248_v45  ;;  %v1297_v5 = vrot.slane %v1283_v44, %v2248_v45  ;;  %v1298_v47 = vcombine.low %v1266_v41, %v1281_v42  ;;  %v1299_v49 = vcombine.high %v1266_v41, %v1281_v42 }
 0x857   :  { %v1306_v50 = vrot.slane %v1298_v47, %v2248_v45  ;;  %v1313_v51 = vrot.slane %v1299_v49, %v2248_v45  ;;  %v1314_v58 = vcombine.high %v1290_v46, %v2086_v1  ;;  %v1315_v53 = vcombine.high %v1297_v5, %v2086_v1 }
 0x859   :  { %v1316_v54 = vcombine.high %v1306_v50, %v2086_v1  ;;  %v1317_v56 = vcombine.high %v1313_v51, %v2086_v1  ;;  %v1326_v57 = vcombine.low %v1290_v46, %v1314_v58  ;;  %v1327_v61 = vcombine.low %v1297_v5, %v1315_v53  ;;  %v2006_v46 = vld [vmem:[%s2544_s8] sm:$0xff]  }
 0x85a   :  { %v1785_v5 = vld [vmem:[%s2543_s7] ss:$0 sm:$0xff]  ;;  %s2104_s7 = smov [#allocation6]  }
 0x85b   :  { %v1334_v62 = vrot.slane %v1326_v57, %v2182_v8  ;;  %v1341_v0 = vrot.slane %v1327_v61, %v2182_v8  ;;  %v1343_v2 = vcombine.low %v1306_v50, %v1316_v54  ;;  %v1344_v3 = vcombine.low %v1313_v51, %v1317_v56 }
 0x85d   :  { %v1351_v15 = vrot.slane %v1343_v2, %v2182_v8  ;;  %v1358_v45 = vrot.slane %v1344_v3, %v2182_v8  ;;  %v1342_v18 = vcombine.low %v1334_v62, %v1341_v0 }
 0x85f   :  { %v1359_v59 = vcombine.low %v1351_v15, %v1358_v45 }
 0x861   :  { %v1362_v20 = vpack.c.bf16 %v1359_v59, %v1342_v18 }
 0x863   :  { %1950 = vmatmul.mubr.msk.bf16.vlgmr.msra.gmra.mxu1 %vm127_vm1, %v1362_v20 }
 0x864   :  { %1969 = vmatprep.mubr.msk.bf16.mxu1 %vm2087_vm0, %v2086_v1  ;;  %1962 = vmatpush3.bf16.msra.mxu1 %v2003_v63 }
 0x865   :  { %1963 = vmatprep.subr.bf16.mxu1 %v2086_v1 }
 0x923   :  { %v1423_v55 = vpop.f32.mrf.mxu1 }
 0x924   :  { %v1424_v23 = vadd.f32 %v1781_v60, %v1423_v55 }
 0x925   :  { %v1951_v24 = vpop.f32.mrf.mxu1 }
 0x926   :  { %v1432_v7 = vcombine.high %v1424_v23, %v1424_v23  ;;  %v1439_v19 = vrot.slane %v1424_v23, %v2182_v8 }
 0x927   :  { %v1426_v25 = vpop.f32.mrf.mxu1 }
 0x928   :  { %v1446_v26 = vrot.slane %v1432_v7, %v2182_v8  ;;  %v1447_v27 = vcombine.high %v1439_v19, %v1439_v19  ;;  %v1427_v28 = vadd.f32 %v1781_v60, %v1426_v25  ;;  %v1474_v36 = vadd.f32 %v1439_v19, %v2187_v9 }
 0x929   :  { %v1952_v29 = vpop.f32.mrf.mxu1 }
 0x92a   :  { %v1448_v34 = vcombine.high %v1446_v26, %v1446_v26  ;;  %v1449_v30 = vcombine.high %v1427_v28, %v1427_v28  ;;  %v1456_v38 = vrot.slane %v1427_v28, %v2182_v8  ;;  %v1475_v31 = vadd.f32 %v1447_v27, %v2192_v10 }
 0x92b   :  { %v1476_v32 = vadd.f32 %v1446_v26, %v2197_v11 }
 0x92c   :  { %v1477_v33 = vadd.f32 %v1448_v34, %v2203_v12  ;;  %v1463_v35 = vrot.slane %v1449_v30, %v2182_v8  ;;  %v1464_v6 = vcombine.high %v1456_v38, %v1456_v38  ;;  %v1478_v37 = vadd.f32 %v1456_v38, %v2208_v13 }
 0x92d   :  { %v1490_v52 = vcombine.low %v1474_v36, %v1475_v31 }
 0x92e   :  { %v1491_v4 = vcombine.low %v1476_v32, %v1477_v33  ;;  %v1465_v48 = vcombine.high %v1463_v35, %v1463_v35  ;;  %v2489_v39 = vadd.f32 %v1464_v6, %v2213_v14  ;;  %v1480_v40 = vadd.f32 %v1463_v35, %v2220_v16  ;;  %v2004_v16 = vld [vmem:[%s2544_s8 + $0x10] sm:$0xff]  }
 0x92f   :  { %v1498_v9 = vrot.slane %v1490_v52, %v2182_v8  ;;  %1964 = vmatpush3.bf16.msra.mxu1 %v2004_v16 }
 0x930   :  { %v2493_v10 = vadd.f32 %v1465_v48, %v2225_v17  ;;  %v1507_v11 = vcombine.low %v1478_v37, %v2489_v39  ;;  %v1505_v12 = vrot.slane %v1491_v4, %v2182_v8  ;;  %1965 = vmatprep.subr.bf16.mxu1 %v2086_v1  ;;  %v2005_v17 = vld [vmem:[%s2544_s8 + $0x8] sm:$0xff]   ;;  %s1747_s8 = sshll.u32 %s2104_s7, 4  ;;  %s1748_s8 = int_to_ptr.vmem [resolvable:$true] %s1747_s8 }
 0x931   :  { %p2064_p6 = scmp.lt.s32.totalorder %s1748_s8, %s1748_s8 }
 0x932   :  { %v1508_v41 = vcombine.low %v1480_v40, %v2493_v10  ;;  %v1515_v42 = vrot.slane %v1507_v11, %v2182_v8  ;;  %v1506_v14 = vcombine.low %v1498_v9, %v1505_v12 }
 0x933   :  { %1966 = vmatpush3.bf16.msra.mxu1 %v2005_v17 }
 0x934   :  { %v1522_v13 = vrot.slane %v1508_v41, %v2182_v8  ;;  %1967 = vmatprep.subr.bf16.mxu1 %v2086_v1  ;;  %v1789_v1 = vld [vmem:[%s2545_s9] ss:$0 sm:$0xff]  ;;  %s2059_s9 = scalar_lea.vmem %s1748_s8, 256 }
 0x935   :  { %p2060_p5 = scmp.ne.s32.totalorder %s1748_s8, %s2059_s9  ;;  %p2065_p7 = scmp.lt.s32.totalorder %s2059_s9, %s2059_s9 }
 0x936   :  { %v1523_v43 = vcombine.low %v1515_v42, %v1522_v13 }
 0x937   :  { %1968 = vmatpush3.bf16.msra.mxu1 %v2006_v46  ;;  %p2066_p8 = por %p2065_p7, %p2064_p6 }
 0x938   :  { %v1526_v44 = vpack.c.bf16 %v1523_v43, %v1506_v14 }
 0x939   :  { %p2067_p9 = pnand %p2066_p8, %p2060_p5 }
 0x93a   :  { %1958 = vmatmul.mubr.msk.bf16.vlgmr.msra.gmra.mxu0 %vm127_vm1, %v1526_v44 }
 0x9fa   :  { %v1587_v47 = vpop.f32.mrf.mxu0 }
 0x9fb   :  { %v1588_v50 = vadd.f32 %v1785_v5, %v1587_v47 }
 0x9fc   :  { %v1959_v49 = vpop.f32.mrf.mxu0 }
 0x9fd   :  { %v1594_v54 = vmax.f32 %v1588_v50, 0.0 }
 0x9fe   :  { %v1590_v51 = vpop.f32.mrf.mxu0 }
 0x9ff   :  { %v1591_v58 = vadd.f32 %v1785_v5, %v1590_v51 }
 0xa00   :  { %v1960_v53 = vpop.f32.mrf.mxu0 }
 0xa01   :  { %v1595_v56 = vmax.f32 %v1591_v58, 0.0 }
 0xa03   :  { %v1596_v57 = vpack.c.bf16 %v1595_v56, %v1594_v54 }
 0xa05   :  { %1970 = vmatmul.mubr.msk.bf16.vlgmr.msra.gmra.mxu1 %vm1636_vm7, %v1596_v57 }
 0xac5   :  { %v1674_v61 = vpop.f32.mrf.mxu1 }
 0xac6   :  { %v1675_v62 = vadd.f32 %v1789_v1, %v1674_v61 }
 0xac7   :  { %v1971_v0 = vpop.f32.mrf.mxu1 }
 0xac8   :  { %v1683_v2 = vcombine.high %v1675_v62, %v1675_v62  ;;  %v1690_v3 = vrot.slane %v1675_v62, %v2182_v8 }
 0xac9   :  { %v1677_v15 = vpop.f32.mrf.mxu1 }
 0xaca   :  { %v1697_v45 = vrot.slane %v1683_v2, %v2182_v8  ;;  %v1698_v18 = vcombine.high %v1690_v3, %v1690_v3  ;;  %v1725_v59 = vadd.f32 %v1690_v3, %v1474_v36  ;;  %v1678_v20 = vadd.f32 %v1789_v1, %v1677_v15 }
 0xacb   :  { %v1972_v21 = vpop.f32.mrf.mxu1 }
 0xacc   :  { %v1699_v22 = vcombine.high %v1697_v45, %v1697_v45  ;;  %v1726_v63 = vadd.f32 %v1698_v18, %v1475_v31  ;;  %v1727_v60 = vadd.f32 %v1697_v45, %v1476_v32  ;;  %1734 = vst.msk [vmem:[#allocation6] sm:$0x3] %vm1733_vm8, %v1725_v59  ;;  %v1700_v55 = vcombine.high %v1678_v20, %v1678_v20 }
 0xacd   :  { %v1707_v23 = vrot.slane %v1678_v20, %v2182_v8 }
 0xace   :  { %v1728_v24 = vadd.f32 %v1699_v22, %v1477_v33  ;;  %1735 = vst.msk [vmem:[#allocation6 + $0x2] sm:$0x3] %vm1733_vm8, %v1726_v63  ;;  %1736 = vst.msk [vmem:[#allocation6 + $0x4] sm:$0x3] %vm1733_vm8, %v1727_v60  ;;  %v1714_v7 = vrot.slane %v1700_v55, %v2182_v8 }
 0xacf   :  { %v1715_v19 = vcombine.high %v1707_v23, %v1707_v23  ;;  %v1729_v25 = vadd.f32 %v1707_v23, %v1478_v37 }
 0xad0   :  { %1737 = vst.msk [vmem:[#allocation6 + $0x6] sm:$0x3] %vm1733_vm8, %v1728_v24  ;;  %v1716_v26 = vcombine.high %v1714_v7, %v1714_v7  ;;  %v1731_v27 = vadd.f32 %v1714_v7, %v1480_v40 }
 0xad1   :  { %v1730_v28 = vadd.f32 %v1715_v19, %v2489_v39  ;;  %1738 = vst.msk [vmem:[#allocation6 + $0x8] sm:$0x3] %vm1733_vm8, %v1729_v25 }
 0xad2   :  { %v1732_v29 = vadd.f32 %v1716_v26, %v2493_v10  ;;  %1740 = vst.msk [vmem:[#allocation6 + $0xc] sm:$0x3] %vm1733_vm8, %v1731_v27 }
 0xad3   :  { %1739 = vst.msk [vmem:[#allocation6 + $0xa] sm:$0x3] %vm1733_vm8, %v1730_v28 }
 0xad4   :  { %1741 = vst.msk [vmem:[#allocation6 + $0xe] sm:$0x3] %vm1733_vm8, %v1732_v29 }
 0xad5   :  { %2070 = shalt.err (!%p2067_p9)
}
 0xad6   :  { %s2105_s16 = smov 32   ;;  %s2106_s23 = smov 2  }
 0xad7   :  { %1753 = dma.vmem_to_hbm [thread:$0]  %s1748_s8, 256, %s2546_s10, [#allocation5], %s2105_s16, %s2105_s16, %s2106_s23  }
 0xad8   :  { %2081 = dma.done.wait [#allocation5], 256  }
 0xad9   :  { %2082 = vsyncadd [#allocation5], 4294967040 }
 0xada   :  { %1757 = vsyncpa [#allocation4], 1 }
 0xadb   :  { %1758 = vsyncpa [#allocation5], 1 }

</bundles_post_ra>
